<compile_context>
chip_gen: v7x
topology: tpu7x:2x2x1
jax: 0.10.0
libtpu: 0.0.40
codegen_flags: <defaults>
</compile_context>

<pallas_src>
import functools

import jax
import jax.numpy as jnp
from jax.experimental import pallas as pl
from jax.experimental.pallas import tpu as pltpu


# ---------------------------------------------------------------------------
# Pallas kernel: fused 3x3 conv (3 accumulating K=3*Cin MXU dots) + BN bias [+ReLU] [+skip]
# ---------------------------------------------------------------------------
def _conv3x3_bn_kernel(x_ref, w_ref, bias_ref, *rest, stride, th, wo, relu, add_skip):
    """One (image, row-tile) grid step.

    x_ref    : (stride*stride, Hs, Ws, Cin)  bf16  phase-split padded image (resident per image)
    w_ref    : (3, 3*Cin, Cout)              bf16  kw-merged weights, BN scale pre-folded
    bias_ref : (1, Cout)                     f32   folded BatchNorm bias
    skip_ref : (1, th*wo, Cout)              optional residual
    out_ref  : (1, th*wo, Cout)
    """
    if add_skip:
        skip_ref, out_ref = rest
    else:
        (out_ref,) = rest

    row0 = pl.multiple_of(pl.program_id(1) * th, th)    # first output row of this tile

    acc = None
    for kh in range(3):
        ph, dh = kh % stride, kh // stride               # phase / in-phase offset of this row tap
        # kw-merge: concat the 3 width-shifted taps along the channel (lane) axis so this
        # kh contributes ONE accumulating MXU matmul with K = 3*Cin.
        taps = []
        for kw in range(3):
            pw, dw = kw % stride, kw // stride
            taps.append(x_ref[ph * stride + pw, pl.ds(row0 + dh, th), pl.ds(dw, wo), :])
        xs = jnp.concatenate(taps, axis=-1)              # (th, wo, 3*Cin) built in VMEM
        contrib = jnp.dot(xs.reshape(th * wo, xs.shape[-1]), w_ref[kh],
                          preferred_element_type=jnp.float32)
        acc = contrib if acc is None else acc + contrib  # only 2 partial-sum adds total

    y = acc + bias_ref[...]                              # BN scale already folded into weights
    if relu:
        y = jnp.maximum(y, 0.0)
    if add_skip:
        y = y + skip_ref[0].astype(jnp.float32)          # residual add in f32, in-kernel
    out_ref[0] = y.astype(out_ref.dtype)


def conv3x3_bn(x, w, bn_scale, bn_bias, *, stride=1, relu=False, skip=None,
               out_dtype=jnp.float32, block_rows=512):
    """3x3 conv (pad=1, no bias) + folded BatchNorm, optional ReLU / residual add.

    x    : (N, H, W, Cin)
    w    : (3, 3, Cin, Cout)  HWIO
    skip : optional (N, Ho, Wo, Cout) residual added after BN
    returns (N, Ho, Wo, Cout) in `out_dtype`
    """
    N, H, W, Cin = x.shape
    Cout = w.shape[-1]
    s = int(stride)
    Ho = (H + 2 - 3) // s + 1
    Wo = (W + 2 - 3) // s + 1

    # pad=1 spatially (rounded up so padded H/W are multiples of the stride), bf16 MXU operands.
    Hp = -(-(H + 2) // s) * s
    Wp = -(-(W + 2) // s) * s
    xp = jnp.pad(x.astype(jnp.bfloat16),
                 ((0, 0), (1, Hp - H - 1), (1, Wp - W - 1), (0, 0)))
    Hs, Ws = Hp // s, Wp // s
    # phase split so the kernel only needs unit-stride slices:
    #   xph[n*s*s + a*s + b, r, c, :] == xp[n, s*r + a, s*c + b, :]
    if s == 1:
        xph = xp
    else:
        xph = (xp.reshape(N, Hs, s, Ws, s, Cin)
                 .transpose(0, 2, 4, 1, 3, 5)
                 .reshape(N * s * s, Hs, Ws, Cin))

    # Fold BN scale into the weights (wrapper-side, before the bf16 cast) and merge the kw
    # axis into K: (3, 3, Cin, Cout) -> (3, 3*Cin, Cout), channel index = kw*Cin + c, which
    # matches the in-kernel concat order.
    wq = (w * bn_scale.reshape(1, 1, 1, Cout)).reshape(3, 3 * Cin, Cout).astype(jnp.bfloat16)
    bias2 = bn_bias.reshape(1, Cout).astype(jnp.float32)

    # Row tile: largest divisor of Ho whose flattened row count fits `block_rows`
    # and keeps the block's second-to-last dim 8-aligned (or the full extent).
    TH = Ho
    for d in range(Ho, 0, -1):
        if Ho % d == 0 and d * Wo <= max(block_rows, Wo) and (d == Ho or (d * Wo) % 8 == 0):
            TH = d
            break
    nT = Ho // TH

    add_skip = skip is not None
    in_specs = [
        # whole phase-split image per batch; block index constant along t -> stays resident
        pl.BlockSpec((s * s, Hs, Ws, Cin), lambda n, t: (n, 0, 0, 0)),
        pl.BlockSpec((3, 3 * Cin, Cout), lambda n, t: (0, 0, 0)),
        pl.BlockSpec((1, Cout), lambda n, t: (0, 0)),
    ]
    args = [xph, wq, bias2]
    if add_skip:
        in_specs.append(pl.BlockSpec((1, TH * Wo, Cout), lambda n, t: (n, t, 0)))
        args.append(skip.reshape(N, Ho * Wo, Cout))      # free reshape, no wrapper-side cast

    kernel = functools.partial(_conv3x3_bn_kernel, stride=s, th=TH, wo=Wo,
                               relu=relu, add_skip=add_skip)
    out = pl.pallas_call(
        kernel,
        out_shape=jax.ShapeDtypeStruct((N, Ho * Wo, Cout), out_dtype),
        grid=(N, nT),
        in_specs=in_specs,
        out_specs=pl.BlockSpec((1, TH * Wo, Cout), lambda n, t: (n, t, 0)),
        compiler_params=pltpu.CompilerParams(
            dimension_semantics=("parallel", "parallel"),
            vmem_limit_bytes=32 * 1024 * 1024,           # explicit, safe on v5e/v6e/v7x
        ),
    )(*args)
    return out.reshape(N, Ho, Wo, Cout)


# ---------------------------------------------------------------------------
# Block forward (matches the PyTorch module: no ReLU after the residual add)
# ---------------------------------------------------------------------------
def _fold_bn(gamma, beta, mean, var, eps=1e-5):
    scale = gamma / jnp.sqrt(var + eps)
    bias = beta - mean * scale
    return scale, bias


def block_forward(x_nchw, params, *, stride=1, downsample=False, block_rows=512):
    x = jnp.transpose(x_nchw, (0, 2, 3, 1)).astype(jnp.float32)   # NCHW -> NHWC

    s1, b1 = _fold_bn(*params["bn1"])
    s2, b2 = _fold_bn(*params["bn2"])

    # conv1 output feeds only conv2's MXU -> emit directly in bf16 (halves intermediate traffic).
    out = conv3x3_bn(x, params["w1"], s1, b1, stride=stride, relu=True,
                     out_dtype=jnp.bfloat16, block_rows=block_rows)

    if downsample:
        sd, bd = _fold_bn(*params["bnd"])
        skip = conv3x3_bn(x, params["wd"], sd, bd, stride=stride, relu=False,
                          out_dtype=jnp.float32, block_rows=block_rows)
    else:
        assert stride == 1 and params["w1"].shape[2] == params["w1"].shape[3], (
            "identity skip requires in_c == out_c and stride == 1")
        skip = x

    out = conv3x3_bn(out, params["w2"], s2, b2, stride=1, relu=False, skip=skip,
                     out_dtype=jnp.float32, block_rows=block_rows)
    return jnp.transpose(out, (0, 3, 1, 2))                       # NHWC -> NCHW


# ---------------------------------------------------------------------------
# Deterministic parameters + reference (same precision policy: BN scale folded
# into bf16 weights, bf16 activations, f32 accumulation)
# ---------------------------------------------------------------------------
def make_params(key, in_c, out_c, downsample):
    ks = jax.random.split(key, 16)

    def conv_w(k, cin, cout):
        return (jax.random.normal(k, (3, 3, cin, cout), jnp.float32)
                * (1.0 / jnp.sqrt(9.0 * cin)))

    def bn_params(k):
        k1, k2, k3, k4 = jax.random.split(k, 4)
        gamma = jax.random.uniform(k1, (out_c,), jnp.float32, 0.5, 1.5)
        beta = 0.1 * jax.random.normal(k2, (out_c,), jnp.float32)
        mean = 0.1 * jax.random.normal(k3, (out_c,), jnp.float32)
        var = jax.random.uniform(k4, (out_c,), jnp.float32, 0.5, 1.5)
        return (gamma, beta, mean, var)

    params = {
        "w1": conv_w(ks[0], in_c, out_c),
        "w2": conv_w(ks[1], out_c, out_c),
        "bn1": bn_params(ks[2]),
        "bn2": bn_params(ks[3]),
    }
    if downsample:
        params["wd"] = conv_w(ks[4], in_c, out_c)
        params["bnd"] = bn_params(ks[5])
    return params


def block_forward_ref(x_nchw, params, *, stride=1, downsample=False):
    x = jnp.transpose(x_nchw, (0, 2, 3, 1)).astype(jnp.float32)

    def conv_bn(h, w, bn, s, relu=False):
        # same declared precision policy as the kernel: BN scale folded into bf16 weights,
        # bf16 activations, f32 accumulation, f32 bias add
        scale, bias = _fold_bn(*bn)
        wf = (w * scale.reshape(1, 1, 1, -1)).astype(jnp.bfloat16)
        y = jax.lax.conv_general_dilated(
            h.astype(jnp.bfloat16), wf, (s, s), ((1, 1), (1, 1)),
            dimension_numbers=("NHWC", "HWIO", "NHWC"),
            preferred_element_type=jnp.float32) + bias
        return jax.nn.relu(y) if relu else y

    out = conv_bn(x, params["w1"], params["bn1"], stride, relu=True)
    out = conv_bn(out, params["w2"], params["bn2"], 1)
    skip = conv_bn(x, params["wd"], params["bnd"], stride) if downsample else x
    return jnp.transpose(out + skip, (0, 3, 1, 2))


if __name__ == "__main__":
    key = jax.random.PRNGKey(0)
    kx, kp1, kp2 = jax.random.split(key, 3)

    fwd = jax.jit(block_forward, static_argnames=("stride", "downsample", "block_rows"))
    ref = jax.jit(block_forward_ref, static_argnames=("stride", "downsample"))

    # Case 1: downsampling block (in_c=4 -> out_c=8, stride=2, downsample=True)
    x1 = jax.random.normal(kx, (2, 4, 16, 16), jnp.float32)
    p1 = make_params(kp1, in_c=4, out_c=8, downsample=True)
    y1 = jax.block_until_ready(fwd(x1, p1, stride=2, downsample=True, block_rows=128))
    y1_ref = ref(x1, p1, stride=2, downsample=True)
    assert y1.shape == (2, 8, 8, 8)
    assert jnp.allclose(y1, y1_ref, rtol=1e-2, atol=1e-2), "mismatch (downsample case)"

    # Case 2: identity block (in_c == out_c = 4, stride=1); block_rows=128 exercises row tiling.
    x2 = jax.random.normal(kx, (2, 4, 16, 16), jnp.float32)
    p2 = make_params(kp2, in_c=4, out_c=4, downsample=False)
    y2 = jax.block_until_ready(fwd(x2, p2, stride=1, downsample=False, block_rows=128))
    y2_ref = ref(x2, p2, stride=1, downsample=False)
    assert y2.shape == (2, 4, 16, 16)
    assert jnp.allclose(y2, y2_ref, rtol=1e-2, atol=1e-2), "mismatch (identity case)"

    print("KERNEL_OK")
</pallas_src>

<mosaic_0001>
module attributes {stable_mosaic.version = 11 : i64} {
  func.func @_conv3x3_bn_kernel(%arg0: i32, %arg1: i32, %arg2: memref<4x9x9x4xbf16, #tpu.memory_space<vmem>>, %arg3: memref<3x12x8xbf16, #tpu.memory_space<vmem>>, %arg4: memref<1x8xf32, #tpu.memory_space<vmem>>, %arg5: memref<1x64x8xbf16, #tpu.memory_space<vmem>>) attributes {dimension_semantics = [#tpu.dimension_semantics<parallel>, #tpu.dimension_semantics<parallel>], iteration_bounds = array<i64: 2, 1>, scalar_prefetch = 0 : i64, scratch_operands = 0 : i64, tpu.core_type = #tpu.core_type<tc>, window_params = [{transform_indices = @transform_0, window_bounds = array<i64: 4, 9, 9, 4>}, {pipeline_mode = #tpu.pipeline_mode<synchronous>, transform_indices = @transform_1, window_bounds = array<i64: 3, 12, 8>}, {pipeline_mode = #tpu.pipeline_mode<synchronous>, transform_indices = @transform_2, window_bounds = array<i64: 1, 8>}, {transform_indices = @transform_3, window_bounds = array<i64: 1, 64, 8>}]} {
    %c8_i32 = arith.constant 8 : i32
    %0 = arith.muli %arg1, %c8_i32 : i32
    %1 = tpu.assume_multiple %0, 8 : i32
    %c0_i32 = arith.constant 0 : i32
    %2 = arith.addi %1, %c0_i32 : i32
    %c0 = arith.constant 0 : index
    %3 = arith.index_cast %2 : i32 to index
    %c0_0 = arith.constant 0 : index
    %c0_1 = arith.constant 0 : index
    %4 = vector.load %arg2[%c0, %3, %c0_0, %c0_1] : memref<4x9x9x4xbf16, #tpu.memory_space<vmem>>, vector<1x8x8x4xbf16>
    %5 = vector.shape_cast %4 : vector<1x8x8x4xbf16> to vector<8x8x4xbf16>
    %c0_i32_2 = arith.constant 0 : i32
    %6 = arith.addi %1, %c0_i32_2 : i32
    %c1 = arith.constant 1 : index
    %7 = arith.index_cast %6 : i32 to index
    %c0_3 = arith.constant 0 : index
    %c0_4 = arith.constant 0 : index
    %8 = vector.load %arg2[%c1, %7, %c0_3, %c0_4] : memref<4x9x9x4xbf16, #tpu.memory_space<vmem>>, vector<1x8x8x4xbf16>
    %9 = vector.shape_cast %8 : vector<1x8x8x4xbf16> to vector<8x8x4xbf16>
    %c0_i32_5 = arith.constant 0 : i32
    %10 = arith.addi %1, %c0_i32_5 : i32
    %c0_6 = arith.constant 0 : index
    %11 = arith.index_cast %10 : i32 to index
    %c1_7 = arith.constant 1 : index
    %c0_8 = arith.constant 0 : index
    %12 = vector.load %arg2[%c0_6, %11, %c1_7, %c0_8] : memref<4x9x9x4xbf16, #tpu.memory_space<vmem>>, vector<1x8x8x4xbf16>
    %13 = vector.shape_cast %12 : vector<1x8x8x4xbf16> to vector<8x8x4xbf16>
    %14 = tpu.concatenate %5, %9, %13 in 2 : vector<8x8x4xbf16>, vector<8x8x4xbf16>, vector<8x8x4xbf16> -> vector<8x8x12xbf16>
    %15 = vector.shape_cast %14 : vector<8x8x12xbf16> to vector<64x12xbf16>
    %c0_9 = arith.constant 0 : index
    %c0_10 = arith.constant 0 : index
    %c0_11 = arith.constant 0 : index
    %16 = vector.load %arg3[%c0_9, %c0_10, %c0_11] : memref<3x12x8xbf16, #tpu.memory_space<vmem>>, vector<1x12x8xbf16>
    %17 = vector.shape_cast %16 : vector<1x12x8xbf16> to vector<12x8xbf16>
    %cst = arith.constant dense<0.000000e+00> : vector<64x8xf32>
    %18 = tpu.matmul %15, %17, %cst {dimension_numbers = #tpu.dot_dimension_numbers<[1], [0], [0], [1], [0, 0, 1, 1], [], []>} : vector<64x12xbf16>, vector<12x8xbf16>, vector<64x8xf32> -> vector<64x8xf32>
    %c0_i32_12 = arith.constant 0 : i32
    %19 = arith.addi %1, %c0_i32_12 : i32
    %c2 = arith.constant 2 : index
    %20 = arith.index_cast %19 : i32 to index
    %c0_13 = arith.constant 0 : index
    %c0_14 = arith.constant 0 : index
    %21 = vector.load %arg2[%c2, %20, %c0_13, %c0_14] : memref<4x9x9x4xbf16, #tpu.memory_space<vmem>>, vector<1x8x8x4xbf16>
    %22 = vector.shape_cast %21 : vector<1x8x8x4xbf16> to vector<8x8x4xbf16>
    %c0_i32_15 = arith.constant 0 : i32
    %23 = arith.addi %1, %c0_i32_15 : i32
    %c3 = arith.constant 3 : index
    %24 = arith.index_cast %23 : i32 to index
    %c0_16 = arith.constant 0 : index
    %c0_17 = arith.constant 0 : index
    %25 = vector.load %arg2[%c3, %24, %c0_16, %c0_17] : memref<4x9x9x4xbf16, #tpu.memory_space<vmem>>, vector<1x8x8x4xbf16>
    %26 = vector.shape_cast %25 : vector<1x8x8x4xbf16> to vector<8x8x4xbf16>
    %c0_i32_18 = arith.constant 0 : i32
    %27 = arith.addi %1, %c0_i32_18 : i32
    %c2_19 = arith.constant 2 : index
    %28 = arith.index_cast %27 : i32 to index
    %c1_20 = arith.constant 1 : index
    %c0_21 = arith.constant 0 : index
    %29 = vector.load %arg2[%c2_19, %28, %c1_20, %c0_21] : memref<4x9x9x4xbf16, #tpu.memory_space<vmem>>, vector<1x8x8x4xbf16>
    %30 = vector.shape_cast %29 : vector<1x8x8x4xbf16> to vector<8x8x4xbf16>
    %31 = tpu.concatenate %22, %26, %30 in 2 : vector<8x8x4xbf16>, vector<8x8x4xbf16>, vector<8x8x4xbf16> -> vector<8x8x12xbf16>
    %32 = vector.shape_cast %31 : vector<8x8x12xbf16> to vector<64x12xbf16>
    %c1_22 = arith.constant 1 : index
    %c0_23 = arith.constant 0 : index
    %c0_24 = arith.constant 0 : index
    %33 = vector.load %arg3[%c1_22, %c0_23, %c0_24] : memref<3x12x8xbf16, #tpu.memory_space<vmem>>, vector<1x12x8xbf16>
    %34 = vector.shape_cast %33 : vector<1x12x8xbf16> to vector<12x8xbf16>
    %cst_25 = arith.constant dense<0.000000e+00> : vector<64x8xf32>
    %35 = tpu.matmul %32, %34, %cst_25 {dimension_numbers = #tpu.dot_dimension_numbers<[1], [0], [0], [1], [0, 0, 1, 1], [], []>} : vector<64x12xbf16>, vector<12x8xbf16>, vector<64x8xf32> -> vector<64x8xf32>
    %36 = arith.addf %18, %35 : vector<64x8xf32>
    %c1_i32 = arith.constant 1 : i32
    %37 = arith.addi %1, %c1_i32 : i32
    %c0_26 = arith.constant 0 : index
    %38 = arith.index_cast %37 : i32 to index
    %c0_27 = arith.constant 0 : index
    %c0_28 = arith.constant 0 : index
    %39 = vector.load %arg2[%c0_26, %38, %c0_27, %c0_28] : memref<4x9x9x4xbf16, #tpu.memory_space<vmem>>, vector<1x8x8x4xbf16>
    %40 = vector.shape_cast %39 : vector<1x8x8x4xbf16> to vector<8x8x4xbf16>
    %c1_i32_29 = arith.constant 1 : i32
    %41 = arith.addi %1, %c1_i32_29 : i32
    %c1_30 = arith.constant 1 : index
    %42 = arith.index_cast %41 : i32 to index
    %c0_31 = arith.constant 0 : index
    %c0_32 = arith.constant 0 : index
    %43 = vector.load %arg2[%c1_30, %42, %c0_31, %c0_32] : memref<4x9x9x4xbf16, #tpu.memory_space<vmem>>, vector<1x8x8x4xbf16>
    %44 = vector.shape_cast %43 : vector<1x8x8x4xbf16> to vector<8x8x4xbf16>
    %c1_i32_33 = arith.constant 1 : i32
    %45 = arith.addi %1, %c1_i32_33 : i32
    %c0_34 = arith.constant 0 : index
    %46 = arith.index_cast %45 : i32 to index
    %c1_35 = arith.constant 1 : index
    %c0_36 = arith.constant 0 : index
    %47 = vector.load %arg2[%c0_34, %46, %c1_35, %c0_36] : memref<4x9x9x4xbf16, #tpu.memory_space<vmem>>, vector<1x8x8x4xbf16>
    %48 = vector.shape_cast %47 : vector<1x8x8x4xbf16> to vector<8x8x4xbf16>
    %49 = tpu.concatenate %40, %44, %48 in 2 : vector<8x8x4xbf16>, vector<8x8x4xbf16>, vector<8x8x4xbf16> -> vector<8x8x12xbf16>
    %50 = vector.shape_cast %49 : vector<8x8x12xbf16> to vector<64x12xbf16>
    %c2_37 = arith.constant 2 : index
    %c0_38 = arith.constant 0 : index
    %c0_39 = arith.constant 0 : index
    %51 = vector.load %arg3[%c2_37, %c0_38, %c0_39] : memref<3x12x8xbf16, #tpu.memory_space<vmem>>, vector<1x12x8xbf16>
    %52 = vector.shape_cast %51 : vector<1x12x8xbf16> to vector<12x8xbf16>
    %cst_40 = arith.constant dense<0.000000e+00> : vector<64x8xf32>
    %53 = tpu.matmul %50, %52, %cst_40 {dimension_numbers = #tpu.dot_dimension_numbers<[1], [0], [0], [1], [0, 0, 1, 1], [], []>} : vector<64x12xbf16>, vector<12x8xbf16>, vector<64x8xf32> -> vector<64x8xf32>
    %54 = arith.addf %36, %53 : vector<64x8xf32>
    %c0_41 = arith.constant 0 : index
    %c0_42 = arith.constant 0 : index
    %55 = vector.load %arg4[%c0_41, %c0_42] : memref<1x8xf32, #tpu.memory_space<vmem>>, vector<1x8xf32>
    %56 = vector.broadcast %55 : vector<1x8xf32> to vector<64x8xf32>
    %57 = arith.addf %54, %56 : vector<64x8xf32>
    %cst_43 = arith.constant 0.000000e+00 : f32
    %58 = vector.broadcast %cst_43 : f32 to vector<64x8xf32>
    %59 = arith.maximumf %57, %58 : vector<64x8xf32>
    %60 = arith.truncf %59 : vector<64x8xf32> to vector<64x8xbf16>
    %c0_44 = arith.constant 0 : index
    %c0_45 = arith.constant 0 : index
    %c0_46 = arith.constant 0 : index
    %61 = vector.load %arg5[%c0_44, %c0_45, %c0_46] : memref<1x64x8xbf16, #tpu.memory_space<vmem>>, vector<1x64x8xbf16>
    %62 = vector.shape_cast %61 : vector<1x64x8xbf16> to vector<64x8xbf16>
    %63 = vector.shape_cast %60 : vector<64x8xbf16> to vector<1x64x8xbf16>
    tpu.vector_store %arg5[%c0_44, %c0_45, %c0_46], %63 {strides = array<i32>} : memref<1x64x8xbf16, #tpu.memory_space<vmem>>, vector<1x64x8xbf16>,
    return
  }
  func.func @transform_0(%arg0: i32, %arg1: i32) -> (i32, i32, i32, i32) {
    %c0_i32 = arith.constant 0 : i32
    %c0_i32_0 = arith.constant 0 : i32
    %c0_i32_1 = arith.constant 0 : i32
    %c0_i32_2 = arith.constant 0 : i32
    return %arg0, %c0_i32, %c0_i32_0, %c0_i32_1 : i32, i32, i32, i32
  }
  func.func @transform_1(%arg0: i32, %arg1: i32) -> (i32, i32, i32) {
    %c0_i32 = arith.constant 0 : i32
    %c0_i32_0 = arith.constant 0 : i32
    %c0_i32_1 = arith.constant 0 : i32
    %c0_i32_2 = arith.constant 0 : i32
    return %c0_i32, %c0_i32_0, %c0_i32_1 : i32, i32, i32
  }
  func.func @transform_2(%arg0: i32, %arg1: i32) -> (i32, i32) {
    %c0_i32 = arith.constant 0 : i32
    %c0_i32_0 = arith.constant 0 : i32
    %c0_i32_1 = arith.constant 0 : i32
    return %c0_i32, %c0_i32_0 : i32, i32
  }
  func.func @transform_3(%arg0: i32, %arg1: i32) -> (i32, i32, i32) {
    %c0_i32 = arith.constant 0 : i32
    %c0_i32_0 = arith.constant 0 : i32
    return %arg0, %arg1, %c0_i32 : i32, i32, i32
  }
}

module attributes {stable_mosaic.version = 11 : i64} {
  func.func @_conv3x3_bn_kernel(%arg0: i32, %arg1: i32, %arg2: memref<4x9x9x4xbf16, #tpu.memory_space<vmem>>, %arg3: memref<3x12x8xbf16, #tpu.memory_space<vmem>>, %arg4: memref<1x8xf32, #tpu.memory_space<vmem>>, %arg5: memref<1x64x8xf32, #tpu.memory_space<vmem>>) attributes {dimension_semantics = [#tpu.dimension_semantics<parallel>, #tpu.dimension_semantics<parallel>], iteration_bounds = array<i64: 2, 1>, scalar_prefetch = 0 : i64, scratch_operands = 0 : i64, tpu.core_type = #tpu.core_type<tc>, window_params = [{transform_indices = @transform_0, window_bounds = array<i64: 4, 9, 9, 4>}, {pipeline_mode = #tpu.pipeline_mode<synchronous>, transform_indices = @transform_1, window_bounds = array<i64: 3, 12, 8>}, {pipeline_mode = #tpu.pipeline_mode<synchronous>, transform_indices = @transform_2, window_bounds = array<i64: 1, 8>}, {transform_indices = @transform_3, window_bounds = array<i64: 1, 64, 8>}]} {
    %c8_i32 = arith.constant 8 : i32
    %0 = arith.muli %arg1, %c8_i32 : i32
    %1 = tpu.assume_multiple %0, 8 : i32
    %c0_i32 = arith.constant 0 : i32
    %2 = arith.addi %1, %c0_i32 : i32
    %c0 = arith.constant 0 : index
    %3 = arith.index_cast %2 : i32 to index
    %c0_0 = arith.constant 0 : index
    %c0_1 = arith.constant 0 : index
    %4 = vector.load %arg2[%c0, %3, %c0_0, %c0_1] : memref<4x9x9x4xbf16, #tpu.memory_space<vmem>>, vector<1x8x8x4xbf16>
    %5 = vector.shape_cast %4 : vector<1x8x8x4xbf16> to vector<8x8x4xbf16>
    %c0_i32_2 = arith.constant 0 : i32
    %6 = arith.addi %1, %c0_i32_2 : i32
    %c1 = arith.constant 1 : index
    %7 = arith.index_cast %6 : i32 to index
    %c0_3 = arith.constant 0 : index
    %c0_4 = arith.constant 0 : index
    %8 = vector.load %arg2[%c1, %7, %c0_3, %c0_4] : memref<4x9x9x4xbf16, #tpu.memory_space<vmem>>, vector<1x8x8x4xbf16>
    %9 = vector.shape_cast %8 : vector<1x8x8x4xbf16> to vector<8x8x4xbf16>
    %c0_i32_5 = arith.constant 0 : i32
    %10 = arith.addi %1, %c0_i32_5 : i32
    %c0_6 = arith.constant 0 : index
    %11 = arith.index_cast %10 : i32 to index
    %c1_7 = arith.constant 1 : index
    %c0_8 = arith.constant 0 : index
    %12 = vector.load %arg2[%c0_6, %11, %c1_7, %c0_8] : memref<4x9x9x4xbf16, #tpu.memory_space<vmem>>, vector<1x8x8x4xbf16>
    %13 = vector.shape_cast %12 : vector<1x8x8x4xbf16> to vector<8x8x4xbf16>
    %14 = tpu.concatenate %5, %9, %13 in 2 : vector<8x8x4xbf16>, vector<8x8x4xbf16>, vector<8x8x4xbf16> -> vector<8x8x12xbf16>
    %15 = vector.shape_cast %14 : vector<8x8x12xbf16> to vector<64x12xbf16>
    %c0_9 = arith.constant 0 : index
    %c0_10 = arith.constant 0 : index
    %c0_11 = arith.constant 0 : index
    %16 = vector.load %arg3[%c0_9, %c0_10, %c0_11] : memref<3x12x8xbf16, #tpu.memory_space<vmem>>, vector<1x12x8xbf16>
    %17 = vector.shape_cast %16 : vector<1x12x8xbf16> to vector<12x8xbf16>
    %cst = arith.constant dense<0.000000e+00> : vector<64x8xf32>
    %18 = tpu.matmul %15, %17, %cst {dimension_numbers = #tpu.dot_dimension_numbers<[1], [0], [0], [1], [0, 0, 1, 1], [], []>} : vector<64x12xbf16>, vector<12x8xbf16>, vector<64x8xf32> -> vector<64x8xf32>
    %c0_i32_12 = arith.constant 0 : i32
    %19 = arith.addi %1, %c0_i32_12 : i32
    %c2 = arith.constant 2 : index
    %20 = arith.index_cast %19 : i32 to index
    %c0_13 = arith.constant 0 : index
    %c0_14 = arith.constant 0 : index
    %21 = vector.load %arg2[%c2, %20, %c0_13, %c0_14] : memref<4x9x9x4xbf16, #tpu.memory_space<vmem>>, vector<1x8x8x4xbf16>
    %22 = vector.shape_cast %21 : vector<1x8x8x4xbf16> to vector<8x8x4xbf16>
    %c0_i32_15 = arith.constant 0 : i32
    %23 = arith.addi %1, %c0_i32_15 : i32
    %c3 = arith.constant 3 : index
    %24 = arith.index_cast %23 : i32 to index
    %c0_16 = arith.constant 0 : index
    %c0_17 = arith.constant 0 : index
    %25 = vector.load %arg2[%c3, %24, %c0_16, %c0_17] : memref<4x9x9x4xbf16, #tpu.memory_space<vmem>>, vector<1x8x8x4xbf16>
    %26 = vector.shape_cast %25 : vector<1x8x8x4xbf16> to vector<8x8x4xbf16>
    %c0_i32_18 = arith.constant 0 : i32
    %27 = arith.addi %1, %c0_i32_18 : i32
    %c2_19 = arith.constant 2 : index
    %28 = arith.index_cast %27 : i32 to index
    %c1_20 = arith.constant 1 : index
    %c0_21 = arith.constant 0 : index
    %29 = vector.load %arg2[%c2_19, %28, %c1_20, %c0_21] : memref<4x9x9x4xbf16, #tpu.memory_space<vmem>>, vector<1x8x8x4xbf16>
    %30 = vector.shape_cast %29 : vector<1x8x8x4xbf16> to vector<8x8x4xbf16>
    %31 = tpu.concatenate %22, %26, %30 in 2 : vector<8x8x4xbf16>, vector<8x8x4xbf16>, vector<8x8x4xbf16> -> vector<8x8x12xbf16>
    %32 = vector.shape_cast %31 : vector<8x8x12xbf16> to vector<64x12xbf16>
    %c1_22 = arith.constant 1 : index
    %c0_23 = arith.constant 0 : index
    %c0_24 = arith.constant 0 : index
    %33 = vector.load %arg3[%c1_22, %c0_23, %c0_24] : memref<3x12x8xbf16, #tpu.memory_space<vmem>>, vector<1x12x8xbf16>
    %34 = vector.shape_cast %33 : vector<1x12x8xbf16> to vector<12x8xbf16>
    %cst_25 = arith.constant dense<0.000000e+00> : vector<64x8xf32>
    %35 = tpu.matmul %32, %34, %cst_25 {dimension_numbers = #tpu.dot_dimension_numbers<[1], [0], [0], [1], [0, 0, 1, 1], [], []>} : vector<64x12xbf16>, vector<12x8xbf16>, vector<64x8xf32> -> vector<64x8xf32>
    %36 = arith.addf %18, %35 : vector<64x8xf32>
    %c1_i32 = arith.constant 1 : i32
    %37 = arith.addi %1, %c1_i32 : i32
    %c0_26 = arith.constant 0 : index
    %38 = arith.index_cast %37 : i32 to index
    %c0_27 = arith.constant 0 : index
    %c0_28 = arith.constant 0 : index
    %39 = vector.load %arg2[%c0_26, %38, %c0_27, %c0_28] : memref<4x9x9x4xbf16, #tpu.memory_space<vmem>>, vector<1x8x8x4xbf16>
    %40 = vector.shape_cast %39 : vector<1x8x8x4xbf16> to vector<8x8x4xbf16>
    %c1_i32_29 = arith.constant 1 : i32
    %41 = arith.addi %1, %c1_i32_29 : i32
    %c1_30 = arith.constant 1 : index
    %42 = arith.index_cast %41 : i32 to index
    %c0_31 = arith.constant 0 : index
    %c0_32 = arith.constant 0 : index
    %43 = vector.load %arg2[%c1_30, %42, %c0_31, %c0_32] : memref<4x9x9x4xbf16, #tpu.memory_space<vmem>>, vector<1x8x8x4xbf16>
    %44 = vector.shape_cast %43 : vector<1x8x8x4xbf16> to vector<8x8x4xbf16>
    %c1_i32_33 = arith.constant 1 : i32
    %45 = arith.addi %1, %c1_i32_33 : i32
    %c0_34 = arith.constant 0 : index
    %46 = arith.index_cast %45 : i32 to index
    %c1_35 = arith.constant 1 : index
    %c0_36 = arith.constant 0 : index
    %47 = vector.load %arg2[%c0_34, %46, %c1_35, %c0_36] : memref<4x9x9x4xbf16, #tpu.memory_space<vmem>>, vector<1x8x8x4xbf16>
    %48 = vector.shape_cast %47 : vector<1x8x8x4xbf16> to vector<8x8x4xbf16>
    %49 = tpu.concatenate %40, %44, %48 in 2 : vector<8x8x4xbf16>, vector<8x8x4xbf16>, vector<8x8x4xbf16> -> vector<8x8x12xbf16>
    %50 = vector.shape_cast %49 : vector<8x8x12xbf16> to vector<64x12xbf16>
    %c2_37 = arith.constant 2 : index
    %c0_38 = arith.constant 0 : index
    %c0_39 = arith.constant 0 : index
    %51 = vector.load %arg3[%c2_37, %c0_38, %c0_39] : memref<3x12x8xbf16, #tpu.memory_space<vmem>>, vector<1x12x8xbf16>
    %52 = vector.shape_cast %51 : vector<1x12x8xbf16> to vector<12x8xbf16>
    %cst_40 = arith.constant dense<0.000000e+00> : vector<64x8xf32>
    %53 = tpu.matmul %50, %52, %cst_40 {dimension_numbers = #tpu.dot_dimension_numbers<[1], [0], [0], [1], [0, 0, 1, 1], [], []>} : vector<64x12xbf16>, vector<12x8xbf16>, vector<64x8xf32> -> vector<64x8xf32>
    %54 = arith.addf %36, %53 : vector<64x8xf32>
    %c0_41 = arith.constant 0 : index
    %c0_42 = arith.constant 0 : index
    %55 = vector.load %arg4[%c0_41, %c0_42] : memref<1x8xf32, #tpu.memory_space<vmem>>, vector<1x8xf32>
    %56 = vector.broadcast %55 : vector<1x8xf32> to vector<64x8xf32>
    %57 = arith.addf %54, %56 : vector<64x8xf32>
    %c0_43 = arith.constant 0 : index
    %c0_44 = arith.constant 0 : index
    %c0_45 = arith.constant 0 : index
    %58 = vector.load %arg5[%c0_43, %c0_44, %c0_45] : memref<1x64x8xf32, #tpu.memory_space<vmem>>, vector<1x64x8xf32>
    %59 = vector.shape_cast %58 : vector<1x64x8xf32> to vector<64x8xf32>
    %60 = vector.shape_cast %57 : vector<64x8xf32> to vector<1x64x8xf32>
    tpu.vector_store %arg5[%c0_43, %c0_44, %c0_45], %60 {strides = array<i32>} : memref<1x64x8xf32, #tpu.memory_space<vmem>>, vector<1x64x8xf32>,
    return
  }
  func.func @transform_0(%arg0: i32, %arg1: i32) -> (i32, i32, i32, i32) {
    %c0_i32 = arith.constant 0 : i32
    %c0_i32_0 = arith.constant 0 : i32
    %c0_i32_1 = arith.constant 0 : i32
    %c0_i32_2 = arith.constant 0 : i32
    return %arg0, %c0_i32, %c0_i32_0, %c0_i32_1 : i32, i32, i32, i32
  }
  func.func @transform_1(%arg0: i32, %arg1: i32) -> (i32, i32, i32) {
    %c0_i32 = arith.constant 0 : i32
    %c0_i32_0 = arith.constant 0 : i32
    %c0_i32_1 = arith.constant 0 : i32
    %c0_i32_2 = arith.constant 0 : i32
    return %c0_i32, %c0_i32_0, %c0_i32_1 : i32, i32, i32
  }
  func.func @transform_2(%arg0: i32, %arg1: i32) -> (i32, i32) {
    %c0_i32 = arith.constant 0 : i32
    %c0_i32_0 = arith.constant 0 : i32
    %c0_i32_1 = arith.constant 0 : i32
    return %c0_i32, %c0_i32_0 : i32, i32
  }
  func.func @transform_3(%arg0: i32, %arg1: i32) -> (i32, i32, i32) {
    %c0_i32 = arith.constant 0 : i32
    %c0_i32_0 = arith.constant 0 : i32
    return %arg0, %arg1, %c0_i32 : i32, i32, i32
  }
}

module attributes {stable_mosaic.version = 11 : i64} {
  func.func @_conv3x3_bn_kernel(%arg0: i32, %arg1: i32, %arg2: memref<1x10x10x8xbf16, #tpu.memory_space<vmem>>, %arg3: memref<3x24x8xbf16, #tpu.memory_space<vmem>>, %arg4: memref<1x8xf32, #tpu.memory_space<vmem>>, %arg5: memref<1x64x8xf32, #tpu.memory_space<vmem>>, %arg6: memref<1x64x8xf32, #tpu.memory_space<vmem>>) attributes {dimension_semantics = [#tpu.dimension_semantics<parallel>, #tpu.dimension_semantics<parallel>], iteration_bounds = array<i64: 2, 1>, scalar_prefetch = 0 : i64, scratch_operands = 0 : i64, tpu.core_type = #tpu.core_type<tc>, window_params = [{transform_indices = @transform_0, window_bounds = array<i64: 1, 10, 10, 8>}, {pipeline_mode = #tpu.pipeline_mode<synchronous>, transform_indices = @transform_1, window_bounds = array<i64: 3, 24, 8>}, {pipeline_mode = #tpu.pipeline_mode<synchronous>, transform_indices = @transform_2, window_bounds = array<i64: 1, 8>}, {transform_indices = @transform_3, window_bounds = array<i64: 1, 64, 8>}, {transform_indices = @transform_4, window_bounds = array<i64: 1, 64, 8>}]} {
    %c8_i32 = arith.constant 8 : i32
    %0 = arith.muli %arg1, %c8_i32 : i32
    %1 = tpu.assume_multiple %0, 8 : i32
    %c0_i32 = arith.constant 0 : i32
    %2 = arith.addi %1, %c0_i32 : i32
    %c0 = arith.constant 0 : index
    %3 = arith.index_cast %2 : i32 to index
    %c0_0 = arith.constant 0 : index
    %c0_1 = arith.constant 0 : index
    %4 = vector.load %arg2[%c0, %3, %c0_0, %c0_1] : memref<1x10x10x8xbf16, #tpu.memory_space<vmem>>, vector<1x8x8x8xbf16>
    %5 = vector.shape_cast %4 : vector<1x8x8x8xbf16> to vector<8x8x8xbf16>
    %c0_i32_2 = arith.constant 0 : i32
    %6 = arith.addi %1, %c0_i32_2 : i32
    %c0_3 = arith.constant 0 : index
    %7 = arith.index_cast %6 : i32 to index
    %c1 = arith.constant 1 : index
    %c0_4 = arith.constant 0 : index
    %8 = vector.load %arg2[%c0_3, %7, %c1, %c0_4] : memref<1x10x10x8xbf16, #tpu.memory_space<vmem>>, vector<1x8x8x8xbf16>
    %9 = vector.shape_cast %8 : vector<1x8x8x8xbf16> to vector<8x8x8xbf16>
    %c0_i32_5 = arith.constant 0 : i32
    %10 = arith.addi %1, %c0_i32_5 : i32
    %c0_6 = arith.constant 0 : index
    %11 = arith.index_cast %10 : i32 to index
    %c2 = arith.constant 2 : index
    %c0_7 = arith.constant 0 : index
    %12 = vector.load %arg2[%c0_6, %11, %c2, %c0_7] : memref<1x10x10x8xbf16, #tpu.memory_space<vmem>>, vector<1x8x8x8xbf16>
    %13 = vector.shape_cast %12 : vector<1x8x8x8xbf16> to vector<8x8x8xbf16>
    %14 = tpu.concatenate %5, %9, %13 in 2 : vector<8x8x8xbf16>, vector<8x8x8xbf16>, vector<8x8x8xbf16> -> vector<8x8x24xbf16>
    %15 = vector.shape_cast %14 : vector<8x8x24xbf16> to vector<64x24xbf16>
    %c0_8 = arith.constant 0 : index
    %c0_9 = arith.constant 0 : index
    %c0_10 = arith.constant 0 : index
    %16 = vector.load %arg3[%c0_8, %c0_9, %c0_10] : memref<3x24x8xbf16, #tpu.memory_space<vmem>>, vector<1x24x8xbf16>
    %17 = vector.shape_cast %16 : vector<1x24x8xbf16> to vector<24x8xbf16>
    %cst = arith.constant dense<0.000000e+00> : vector<64x8xf32>
    %18 = tpu.matmul %15, %17, %cst {dimension_numbers = #tpu.dot_dimension_numbers<[1], [0], [0], [1], [0, 0, 1, 1], [], []>} : vector<64x24xbf16>, vector<24x8xbf16>, vector<64x8xf32> -> vector<64x8xf32>
    %c1_i32 = arith.constant 1 : i32
    %19 = arith.addi %1, %c1_i32 : i32
    %c0_11 = arith.constant 0 : index
    %20 = arith.index_cast %19 : i32 to index
    %c0_12 = arith.constant 0 : index
    %c0_13 = arith.constant 0 : index
    %21 = vector.load %arg2[%c0_11, %20, %c0_12, %c0_13] : memref<1x10x10x8xbf16, #tpu.memory_space<vmem>>, vector<1x8x8x8xbf16>
    %22 = vector.shape_cast %21 : vector<1x8x8x8xbf16> to vector<8x8x8xbf16>
    %c1_i32_14 = arith.constant 1 : i32
    %23 = arith.addi %1, %c1_i32_14 : i32
    %c0_15 = arith.constant 0 : index
    %24 = arith.index_cast %23 : i32 to index
    %c1_16 = arith.constant 1 : index
    %c0_17 = arith.constant 0 : index
    %25 = vector.load %arg2[%c0_15, %24, %c1_16, %c0_17] : memref<1x10x10x8xbf16, #tpu.memory_space<vmem>>, vector<1x8x8x8xbf16>
    %26 = vector.shape_cast %25 : vector<1x8x8x8xbf16> to vector<8x8x8xbf16>
    %c1_i32_18 = arith.constant 1 : i32
    %27 = arith.addi %1, %c1_i32_18 : i32
    %c0_19 = arith.constant 0 : index
    %28 = arith.index_cast %27 : i32 to index
    %c2_20 = arith.constant 2 : index
    %c0_21 = arith.constant 0 : index
    %29 = vector.load %arg2[%c0_19, %28, %c2_20, %c0_21] : memref<1x10x10x8xbf16, #tpu.memory_space<vmem>>, vector<1x8x8x8xbf16>
    %30 = vector.shape_cast %29 : vector<1x8x8x8xbf16> to vector<8x8x8xbf16>
    %31 = tpu.concatenate %22, %26, %30 in 2 : vector<8x8x8xbf16>, vector<8x8x8xbf16>, vector<8x8x8xbf16> -> vector<8x8x24xbf16>
    %32 = vector.shape_cast %31 : vector<8x8x24xbf16> to vector<64x24xbf16>
    %c1_22 = arith.constant 1 : index
    %c0_23 = arith.constant 0 : index
    %c0_24 = arith.constant 0 : index
    %33 = vector.load %arg3[%c1_22, %c0_23, %c0_24] : memref<3x24x8xbf16, #tpu.memory_space<vmem>>, vector<1x24x8xbf16>
    %34 = vector.shape_cast %33 : vector<1x24x8xbf16> to vector<24x8xbf16>
    %cst_25 = arith.constant dense<0.000000e+00> : vector<64x8xf32>
    %35 = tpu.matmul %32, %34, %cst_25 {dimension_numbers = #tpu.dot_dimension_numbers<[1], [0], [0], [1], [0, 0, 1, 1], [], []>} : vector<64x24xbf16>, vector<24x8xbf16>, vector<64x8xf32> -> vector<64x8xf32>
    %36 = arith.addf %18, %35 : vector<64x8xf32>
    %c2_i32 = arith.constant 2 : i32
    %37 = arith.addi %1, %c2_i32 : i32
    %c0_26 = arith.constant 0 : index
    %38 = arith.index_cast %37 : i32 to index
    %c0_27 = arith.constant 0 : index
    %c0_28 = arith.constant 0 : index
    %39 = vector.load %arg2[%c0_26, %38, %c0_27, %c0_28] : memref<1x10x10x8xbf16, #tpu.memory_space<vmem>>, vector<1x8x8x8xbf16>
    %40 = vector.shape_cast %39 : vector<1x8x8x8xbf16> to vector<8x8x8xbf16>
    %c2_i32_29 = arith.constant 2 : i32
    %41 = arith.addi %1, %c2_i32_29 : i32
    %c0_30 = arith.constant 0 : index
    %42 = arith.index_cast %41 : i32 to index
    %c1_31 = arith.constant 1 : index
    %c0_32 = arith.constant 0 : index
    %43 = vector.load %arg2[%c0_30, %42, %c1_31, %c0_32] : memref<1x10x10x8xbf16, #tpu.memory_space<vmem>>, vector<1x8x8x8xbf16>
    %44 = vector.shape_cast %43 : vector<1x8x8x8xbf16> to vector<8x8x8xbf16>
    %c2_i32_33 = arith.constant 2 : i32
    %45 = arith.addi %1, %c2_i32_33 : i32
    %c0_34 = arith.constant 0 : index
    %46 = arith.index_cast %45 : i32 to index
    %c2_35 = arith.constant 2 : index
    %c0_36 = arith.constant 0 : index
    %47 = vector.load %arg2[%c0_34, %46, %c2_35, %c0_36] : memref<1x10x10x8xbf16, #tpu.memory_space<vmem>>, vector<1x8x8x8xbf16>
    %48 = vector.shape_cast %47 : vector<1x8x8x8xbf16> to vector<8x8x8xbf16>
    %49 = tpu.concatenate %40, %44, %48 in 2 : vector<8x8x8xbf16>, vector<8x8x8xbf16>, vector<8x8x8xbf16> -> vector<8x8x24xbf16>
    %50 = vector.shape_cast %49 : vector<8x8x24xbf16> to vector<64x24xbf16>
    %c2_37 = arith.constant 2 : index
    %c0_38 = arith.constant 0 : index
    %c0_39 = arith.constant 0 : index
    %51 = vector.load %arg3[%c2_37, %c0_38, %c0_39] : memref<3x24x8xbf16, #tpu.memory_space<vmem>>, vector<1x24x8xbf16>
    %52 = vector.shape_cast %51 : vector<1x24x8xbf16> to vector<24x8xbf16>
    %cst_40 = arith.constant dense<0.000000e+00> : vector<64x8xf32>
    %53 = tpu.matmul %50, %52, %cst_40 {dimension_numbers = #tpu.dot_dimension_numbers<[1], [0], [0], [1], [0, 0, 1, 1], [], []>} : vector<64x24xbf16>, vector<24x8xbf16>, vector<64x8xf32> -> vector<64x8xf32>
    %54 = arith.addf %36, %53 : vector<64x8xf32>
    %c0_41 = arith.constant 0 : index
    %c0_42 = arith.constant 0 : index
    %55 = vector.load %arg4[%c0_41, %c0_42] : memref<1x8xf32, #tpu.memory_space<vmem>>, vector<1x8xf32>
    %56 = vector.broadcast %55 : vector<1x8xf32> to vector<64x8xf32>
    %57 = arith.addf %54, %56 : vector<64x8xf32>
    %c0_43 = arith.constant 0 : index
    %c0_44 = arith.constant 0 : index
    %c0_45 = arith.constant 0 : index
    %58 = vector.load %arg5[%c0_43, %c0_44, %c0_45] : memref<1x64x8xf32, #tpu.memory_space<vmem>>, vector<1x64x8xf32>
    %59 = vector.shape_cast %58 : vector<1x64x8xf32> to vector<64x8xf32>
    %60 = arith.addf %57, %59 : vector<64x8xf32>
    %c0_46 = arith.constant 0 : index
    %c0_47 = arith.constant 0 : index
    %c0_48 = arith.constant 0 : index
    %61 = vector.load %arg6[%c0_46, %c0_47, %c0_48] : memref<1x64x8xf32, #tpu.memory_space<vmem>>, vector<1x64x8xf32>
    %62 = vector.shape_cast %61 : vector<1x64x8xf32> to vector<64x8xf32>
    %63 = vector.shape_cast %60 : vector<64x8xf32> to vector<1x64x8xf32>
    tpu.vector_store %arg6[%c0_46, %c0_47, %c0_48], %63 {strides = array<i32>} : memref<1x64x8xf32, #tpu.memory_space<vmem>>, vector<1x64x8xf32>,
    return
  }
  func.func @transform_0(%arg0: i32, %arg1: i32) -> (i32, i32, i32, i32) {
    %c0_i32 = arith.constant 0 : i32
    %c0_i32_0 = arith.constant 0 : i32
    %c0_i32_1 = arith.constant 0 : i32
    %c0_i32_2 = arith.constant 0 : i32
    return %arg0, %c0_i32, %c0_i32_0, %c0_i32_1 : i32, i32, i32, i32
  }
  func.func @transform_1(%arg0: i32, %arg1: i32) -> (i32, i32, i32) {
    %c0_i32 = arith.constant 0 : i32
    %c0_i32_0 = arith.constant 0 : i32
    %c0_i32_1 = arith.constant 0 : i32
    %c0_i32_2 = arith.constant 0 : i32
    return %c0_i32, %c0_i32_0, %c0_i32_1 : i32, i32, i32
  }
  func.func @transform_2(%arg0: i32, %arg1: i32) -> (i32, i32) {
    %c0_i32 = arith.constant 0 : i32
    %c0_i32_0 = arith.constant 0 : i32
    %c0_i32_1 = arith.constant 0 : i32
    return %c0_i32, %c0_i32_0 : i32, i32
  }
  func.func @transform_3(%arg0: i32, %arg1: i32) -> (i32, i32, i32) {
    %c0_i32 = arith.constant 0 : i32
    %c0_i32_0 = arith.constant 0 : i32
    return %arg0, %arg1, %c0_i32 : i32, i32, i32
  }
  func.func @transform_4(%arg0: i32, %arg1: i32) -> (i32, i32, i32) {
    %c0_i32 = arith.constant 0 : i32
    %c0_i32_0 = arith.constant 0 : i32
    return %arg0, %arg1, %c0_i32 : i32, i32, i32
  }
}

</mosaic_0001>

<bundles_post_ra>
// kernel: block_forward.3
= control target key start
LH: loop header
LB: loop body
LE: loop exit
PB: predicated region body
PF: predicated region fallthrough
CT: control target
= control target key end

     0   :  { %s1726_s12 = smov 0   ;;  %s1728_s13 = smov 0   ;;  %s2086_s0 = inlined_call_operand.vmem [shape: bf16[8,9,9,4], index: 0, kind: input, shape index: {}]   ;;  %s2087_s1 = inlined_call_operand.vmem [shape: bf16[3,12,8], index: 1, kind: input, shape index: {}]   ;;  %s2088_s2 = inlined_call_operand.vmem [shape: f32[1,8], index: 2, kind: input, shape index: {}]   ;;  %s2089_s3 = inlined_call_operand.vmem [shape: bf16[2,64,8], index: 3, kind: output, shape index: {}]  }
   0x1   :  { %s1730_s14 = smov 0  }
   0x2 LB: > { %s25_s15 = sadd.s32 1, %s1698_s13  ;;  %p1375_p0 = scmp.ge.s32.totalorder %s1702_s14, 1  ;;  %s1702_s14 = sphi %s1730_s14, %s13_s14   ;;  %s1698_s13 = sphi %s1728_s13, %s2091_s13   ;;  %s1694_s12 = sphi %s1726_s12, %s2090_s12  }
   0x3   : > { %p27_p1 = scmp.ge.s32.totalorder %s25_s15, 2  ;;  %p153_p2 = scmp.lt.s32.totalorder %s1702_s14, 3 }
   0x5   : > { %s2093_s15 = smov (%p27_p1, %s25_s15), 0  ;;  %p154_p3 = pnand %p1375_p0, %p153_p2 }
   0x6   : > { %s1376_s16 = sshll.u32 (!%p154_p3), %s1694_s12, 2  ;;  %s1704_s21 = smov (!%p154_p3), 4   ;;  %vm690_vm0 = vcmask (!%p154_p3), 1045504   ;;  %vm383_vm1 = vcmask (!%p154_p3), 31744   ;;  %vm408_vm2 = vcmask (!%p154_p3), 64512   ;;  %vm677_vm3 = vcmask (!%p154_p3), 97280  }
   0x7   : > { %157 = sbr.rel (%p154_p3) target bundleno = 453 (0x1c5), region = 32  ;;  %p183_p4 = scmp.lt.s32.totalorder (!%p154_p3), %s1376_s16, 7  ;;  %vm1258_vm4 = vcmask (!%p154_p3), 60416  }
   0x8   : > { %s1705_s22 = smov (!%p154_p3), 8   ;;  %p190_p5 = scmp.lt.s32.totalorder (!%p154_p3), %s1694_s12, 1 }
   0xe   : > { %s2095_s16 = smov (!%p183_p4, %s1376_s16), 7  ;;  %s2097_s12 = smov (!%p190_p5, %s1694_s12), 1 }
   0xf   : > { %s1602_s17 = smul.u32 72, %s2095_s16  ;;  %s1526_s4 = sshll.u32 %s2097_s12, 5 }
  0x10   : > { %s2059_s7 = scalar_lea.vmem %s2089_s3, %s1526_s4 }
  0x11   : > { %s1750_s20 = scalar_lea.vmem %s2086_s0, %s1602_s17 }
  0x12   : > { %v1629_v0 = vld [vmem:[%s1750_s20 + $0xd8] ss:$0 sps:$4 sm:$0xff]   ;;  %v1630_v1 = vld [vmem:[%s1750_s20 + $0x48] ss:$0 sps:$4 sm:$0xff]   ;;  %v1631_v2 = vld [vmem:[%s1750_s20 + $0xe0] ss:$0 sps:$4 sm:$0xff]  }
  0x13   : > { %481 = vrot.lane.b32.xlu1 %v1629_v0, %s1704_s21  ;;  %255 = vrot.lane.b32.xlu0 %v1630_v1, %s1704_s21  ;;  %v1632_v3 = vld [vmem:[%s1750_s20 + $0x50] ss:$0 sps:$4 sm:$0xff]   ;;  %v1633_v4 = vld [vmem:[%s1750_s20 + $0x60] ss:$0 sps:$4 sm:$0xff]  }
  0x14   : > { %v1634_v5 = vld [vmem:[%s1750_s20 + $0x58] ss:$0 sps:$4 sm:$0xff]   ;;  %v1761_v6 = vld [vmem:[%s1750_s20 + $0x8] sm:$0xf]  ;;  %v224_v7 = vld [vmem:[%s1750_s20 + $0xc] sm:$0x1] }
  0x15   : > { %v1397_v8 = vcombine.low %v1761_v6, %v224_v7  ;;  %v1767_v9 = vld [vmem:[%s1750_s20] sm:$0xf]  ;;  %v223_v10 = vld [vmem:[%s1750_s20 + $0x4] sm:$0x1]  ;;  %v1771_v11 = vld [vmem:[%s1750_s20 + $0x98] sm:$0xf] }
  0x16   : > { %v1396_v12 = vcombine.low %v1767_v9, %v223_v10  ;;  %v1421_v13 = vld [vmem:[%s1750_s20 + $0x9c] sm:$0x1]  ;;  %v1777_v14 = vld [vmem:[%s1750_s20 + $0x90] sm:$0xf]  ;;  %v1420_v15 = vld [vmem:[%s1750_s20 + $0x94] sm:$0x1] }
  0x17   : > { %483 = vrot.lane.b32.xlu1 %v1631_v2, %s1704_s21  ;;  %257 = vrot.lane.b32.xlu0 %v1632_v3, %s1704_s21  ;;  %v1635_v16 = vld [vmem:[%s1750_s20 + $0xf0] ss:$0 sps:$4 sm:$0xff]   ;;  %v321_v17 = vshll.u32 %v1397_v8, 16  ;;  %v1437_v18 = vcombine.low %v1771_v11, %v1421_v13  ;;  %v1436_v19 = vcombine.low %v1777_v14, %v1420_v15  ;;  %v1784_v20 = vld [vmem:[%s1750_s20 + $0x18] sm:$0xf]  ;;  %v319_v22 = vshrl.u32 %v1397_v8, 16 }
  0x18   : > { %v226_v21 = vld [vmem:[%s1750_s20 + $0x1c] sm:$0x1]  ;;  %v314_v23 = vshll.u32 %v1396_v12, 16  ;;  %v1788_v24 = vld [vmem:[%s1750_s20 + $0x10] sm:$0xf]  ;;  %v312_v28 = vshrl.u32 %v1396_v12, 16 }
  0x19   : > { %v225_v25 = vld [vmem:[%s1750_s20 + $0x14] sm:$0x1]  ;;  %v1636_v26 = vld [vmem:[%s1750_s20 + $0xe8] ss:$0 sps:$4 sm:$0xff]   ;;  %v323_v27 = vrot.slane %v321_v17, 1  ;;  %v547_v29 = vshll.u32 %v1437_v18, 16  ;;  %v1399_v30 = vcombine.low %v1784_v20, %v226_v21 }
  0x1a   : > { %v316_v31 = vrot.slane %v314_v23, 1  ;;  %v540_v32 = vshll.u32 %v1436_v19, 16  ;;  %v1796_v33 = vld [vmem:[%s1750_s20 + $0xa8] sm:$0xf]  ;;  %v1423_v34 = vld [vmem:[%s1750_s20 + $0xac] sm:$0x1]  ;;  %v1398_v35 = vcombine.low %v1788_v24, %v225_v25 }
  0x1b   : > { %261 = vrot.lane.b32.xlu1 %v1633_v4, %s1704_s21  ;;  %259 = vrot.lane.b32.xlu0 %v1634_v5, %s1704_s21  ;;  %v1801_v36 = vld [vmem:[%s1750_s20 + $0xa0] sm:$0xf]  ;;  %v1422_v37 = vld [vmem:[%s1750_s20 + $0xa4] sm:$0x1]  ;;  %v545_v38 = vshrl.u32 %v1437_v18, 16  ;;  %v538_v39 = vshrl.u32 %v1436_v19, 16  ;;  %v324_v40 = vor.u32 %v323_v27, %v319_v22  ;;  %v1439_v43 = vcombine.low %v1796_v33, %v1423_v34 }
  0x1c   : > { %v549_v41 = vrot.slane %v547_v29, 1  ;;  %v335_v42 = vshll.u32 %v1399_v30, 16  ;;  %v317_v44 = vor.u32 %v316_v31, %v312_v28  ;;  %v542_v45 = vrot.slane %v540_v32, 1  ;;  %v1812_v59 = vld [vmem:[%s1750_s20 + $0xb8] sm:$0xf] }
  0x1d   : > { %v328_v46 = vshll.u32 %v1398_v35, 16  ;;  %v1438_v47 = vcombine.low %v1801_v36, %v1422_v37  ;;  %v333_v49 = vshrl.u32 %v1399_v30, 16  ;;  %v561_v51 = vshll.u32 %v1439_v43, 16  ;;  %v1425_v63 = vld [vmem:[%s1750_s20 + $0xbc] sm:$0x1] }
  0x1e   : > { %v550_v48 = vor.u32 %v549_v41, %v545_v38  ;;  %v337_v50 = vrot.slane %v335_v42, 1  ;;  %v543_v52 = vor.u32 %v542_v45, %v538_v39  ;;  %v326_v53 = vshrl.u32 %v1398_v35, 16  ;;  %v1817_v0 = vld [vmem:[%s1750_s20 + $0xb0] sm:$0xf]  ;;  %v1424_v1 = vld [vmem:[%s1750_s20 + $0xb4] sm:$0x1] }
  0x1f   : > { %487 = vrot.lane.b32.xlu1 %v1635_v16, %s1704_s21  ;;  %485 = vrot.lane.b32.xlu0 %v1636_v26, %s1704_s21  ;;  %v330_v54 = vrot.slane %v328_v46, 1  ;;  %v554_v55 = vshll.u32 %v1438_v47, 16  ;;  %v559_v57 = vshrl.u32 %v1439_v43, 16  ;;  %v563_v58 = vrot.slane %v561_v51, 1  ;;  %v1825_v7 = vld [vmem:[%s1750_s20 + $0xc8] sm:$0xf] }
  0x20   : > { %v338_v56 = vor.u32 %v337_v50, %v333_v49  ;;  %v552_v61 = vshrl.u32 %v1438_v47, 16  ;;  %v1441_v3 = vcombine.low %v1812_v59, %v1425_v63  ;;  %v1440_v5 = vcombine.low %v1817_v0, %v1424_v1  ;;  %v1427_v8 = vld [vmem:[%s1750_s20 + $0xcc] sm:$0x1]  ;;  %v1829_v10 = vld [vmem:[%s1750_s20 + $0xc0] sm:$0xf] }
  0x21   : > { %v331_v60 = vor.u32 %v330_v54, %v326_v53  ;;  %v556_v62 = vrot.slane %v554_v55, 1  ;;  %v564_v2 = vor.u32 %v563_v58, %v559_v57  ;;  %v1426_v12 = vld [vmem:[%s1750_s20 + $0xc4] sm:$0x1]  ;;  %v1645_v13 = vld [vmem:[%s1750_s20 + $0x100] ss:$0 sps:$4 sm:$0xff]   ;;  %v1443_v16 = vcombine.low %v1825_v7, %v1427_v8 }
  0x22   : > { %v575_v15 = vshll.u32 %v1441_v3, 16  ;;  %v1646_v17 = vld [vmem:[%s1750_s20 + $0xf8] ss:$0 sps:$4 sm:$0xff]   ;;  %v568_v18 = vshll.u32 %v1440_v5, 16  ;;  %v1442_v19 = vcombine.low %v1829_v10, %v1426_v12  ;;  %v1647_v21 = vld [vmem:[%s1750_s20 + $0x110] ss:$0 sps:$4 sm:$0xff]  }
  0x23   : > { %369 = vrot.lane.b32.xlu1 %v324_v40, %s1705_s22  ;;  %367 = vrot.lane.b32.xlu0 %v317_v44, %s1705_s22  ;;  %v557_v4 = vor.u32 %v556_v62, %v552_v61  ;;  %v573_v22 = vshrl.u32 %v1441_v3, 16  ;;  %v589_v25 = vshll.u32 %v1443_v16, 16  ;;  %v1648_v26 = vld [vmem:[%s1750_s20 + $0x108] ss:$0 sps:$4 sm:$0xff]   ;;  %v566_v27 = vshrl.u32 %v1440_v5, 16 }
  0x24   : > { %v577_v23 = vrot.slane %v575_v15, 1  ;;  %v570_v28 = vrot.slane %v568_v18, 1  ;;  %v582_v29 = vshll.u32 %v1442_v19, 16  ;;  %v587_v31 = vshrl.u32 %v1443_v16, 16  ;;  %v1845_v38 = vld [vmem:[%s1750_s20 + $0x10] sm:$0xf] }
  0x25   : > { %v591_v32 = vrot.slane %v589_v25, 1  ;;  %v580_v35 = vshrl.u32 %v1442_v19, 16  ;;  %v1481_v39 = vld [vmem:[%s1750_s20 + $0x14] sm:$0x1]  ;;  %v1849_v40 = vld [vmem:[%s1750_s20 + $0x8] sm:$0xf] }
  0x26   : > { %v578_v30 = vor.u32 %v577_v23, %v573_v22  ;;  %v571_v34 = vor.u32 %v570_v28, %v566_v27  ;;  %v584_v37 = vrot.slane %v582_v29, 1  ;;  %v1480_v41 = vld [vmem:[%s1750_s20 + $0xc] sm:$0x1]  ;;  %v1497_v43 = vcombine.low %v1845_v38, %v1481_v39  ;;  %v1857_v46 = vld [vmem:[%s1750_s20 + $0x20] sm:$0xf] }
  0x27   : > { %595 = vrot.lane.b32.xlu1 %v550_v48, %s1705_s22  ;;  %593 = vrot.lane.b32.xlu0 %v543_v52, %s1705_s22  ;;  %v592_v42 = vor.u32 %v591_v32, %v587_v31  ;;  %v1496_v45 = vcombine.low %v1849_v40, %v1480_v41  ;;  %v1483_v47 = vld [vmem:[%s1750_s20 + $0x24] sm:$0x1]  ;;  %v1864_v49 = vld [vmem:[%s1750_s20 + $0x18] sm:$0xf] }
  0x28   : > { %v585_v44 = vor.u32 %v584_v37, %v580_v35  ;;  %v1677_v48 = vld [vmem:[%s2087_s1] sm:$0x3f]   ;;  %v1482_v50 = vld [vmem:[%s1750_s20 + $0x1c] sm:$0x1]  ;;  %v1678_v51 = vld [vmem:[%s2087_s1 + $0x8] sm:$0x3f]   ;;  %v1499_v55 = vcombine.low %v1857_v46, %v1483_v47 }
  0x29   : > { %1599 = vmatprep.subr.msk.bf16.mxu0 %vm690_vm0, %v1677_v48  ;;  %v1872_v52 = vsel %vm690_vm0, %v1677_v48, 0  ;;  %v1653_v53 = vld [vmem:[%s1750_s20 + $0x58] ss:$0 sps:$4 sm:$0xff]   ;;  %v985_v54 = vshll.u32 %v1497_v43, 16  ;;  %v978_v57 = vshll.u32 %v1496_v45, 16  ;;  %v1498_v58 = vcombine.low %v1864_v49, %v1482_v50  ;;  %1598 = vmatprep.subr.msk.bf16.mxu1 %vm690_vm0, %v1678_v51 }
  0x2a   : > { %1561 = vmatpush3.bf16.msra.mxu0 %v1872_v52  ;;  %v1679_v61 = vld [vmem:[%s2087_s1 + $0x10] sm:$0x3f]   ;;  %v1655_v63 = vld [vmem:[%s1750_s20 + $0x68] ss:$0 sps:$4 sm:$0xff]   ;;  %v983_v1 = vshrl.u32 %v1497_v43, 16  ;;  %v999_v3 = vshll.u32 %v1499_v55, 16 }
  0x2b   : > { %373 = vrot.lane.b32.xlu1 %v338_v56, %s1705_s22  ;;  %371 = vrot.lane.b32.xlu0 %v331_v60, %s1705_s22  ;;  %v1654_v56 = vld [vmem:[%s1750_s20 + $0x50] ss:$0 sps:$4 sm:$0xff]   ;;  %v692_v60 = vsel %vm690_vm0, %v1678_v51, 0  ;;  %v1888_v62 = vsel %vm690_vm0, %v1679_v61, 0  ;;  %v976_v5 = vshrl.u32 %v1496_v45, 16  ;;  %v980_v8 = vrot.slane %v978_v57, 1 }
  0x2c   : > { %1551 = vmatpush3.bf16.msra.mxu1 %v692_v60  ;;  %1601 = vmatprep.subr.msk.bf16.mxu0 %vm690_vm0, %v1679_v61  ;;  %v992_v12 = vshll.u32 %v1498_v58, 16  ;;  %v997_v15 = vshrl.u32 %v1499_v55, 16  ;;  %v1001_v16 = vrot.slane %v999_v3, 1  ;;  %v990_v18 = vshrl.u32 %v1498_v58, 16  ;;  %v1900_v23 = vld [vmem:[%s1750_s20 + $0x28] sm:$0xf] }
  0x2d   : > { %1600 = vmatprep.subr.msk.bf16.mxu1 %vm690_vm0, %v1677_v48  ;;  %v228_v25 = vld [vmem:[%s1750_s20 + $0x2c] sm:$0x1]  ;;  %v227_v27 = vld [vmem:[%s1750_s20 + $0x24] sm:$0x1]  ;;  %v1661_v28 = vld [vmem:[%s1750_s20 + $0x70] ss:$0 sps:$4 sm:$0xff]  }
  0x2e   : > { %v994_v19 = vrot.slane %v992_v12, 1  ;;  %v1401_v29 = vcombine.low %v1900_v23, %v228_v25  ;;  %v1663_v32 = vld [vmem:[%s1750_s20 + $0x78] ss:$0 sps:$4 sm:$0xff]   ;;  %v1918_v39 = vld [vmem:[%s1750_s20 + $0x30] sm:$0xf] }
  0x2f   : > { %599 = vrot.lane.b32.xlu1 %v564_v2, %s1705_s22  ;;  %597 = vrot.lane.b32.xlu0 %v557_v4, %s1705_s22  ;;  %v987_v2 = vrot.slane %v985_v54, 1  ;;  %v1656_v4 = vld [vmem:[%s1750_s20 + $0x60] ss:$0 sps:$4 sm:$0xff]   ;;  %v1485_v41 = vld [vmem:[%s1750_s20 + $0x34] sm:$0x1] }
  0x30   : > { %v995_v22 = vor.u32 %v994_v19, %v990_v18  ;;  %v349_v35 = vshll.u32 %v1401_v29, 16  ;;  %v1484_v43 = vld [vmem:[%s1750_s20 + $0x2c] sm:$0x1]  ;;  %v1666_v45 = vld [vmem:[%s1750_s20 + $0x78] ss:$0 sps:$4 sm:$0xff]   ;;  %v347_v47 = vshrl.u32 %v1401_v29, 16  ;;  %v1501_v50 = vcombine.low %v1918_v39, %v1485_v41 }
  0x31   : > { %v1932_v55 = vld [vmem:[%s1750_s20 + $0x38] sm:$0xf]  ;;  %v1936_v57 = vld [vmem:[%s1750_s20 + $0x30] sm:$0xf]  ;;  %v229_v58 = vld [vmem:[%s1750_s20 + $0x34] sm:$0x1] }
  0x32   : > { %v351_v48 = vrot.slane %v349_v35, 1  ;;  %v1013_v61 = vshll.u32 %v1501_v50, 16  ;;  %v1402_v3 = vcombine.low %v1936_v57, %v229_v58  ;;  %v1486_v12 = vld [vmem:[%s1750_s20 + $0x3c] sm:$0x1]  ;;  %v1670_v19 = vld [vmem:[%s1750_s20 + $0x80] ss:$0 sps:$4 sm:$0xff]  }
  0x33   : > { %491 = vrot.lane.b32.xlu1 %v1645_v13, %s1704_s21  ;;  %489 = vrot.lane.b32.xlu0 %v1646_v17, %s1704_s21  ;;  %v988_v13 = vor.u32 %v987_v2, %v983_v1  ;;  %v981_v17 = vor.u32 %v980_v8, %v976_v5  ;;  %v1487_v5 = vld [vmem:[%s1750_s20 + $0x44] sm:$0x1]  ;;  %v1948_v8 = vld [vmem:[%s1750_s20 + $0x38] sm:$0xf] }
  0x34   : > { %v352_v60 = vor.u32 %v351_v48, %v347_v47  ;;  %v356_v25 = vshll.u32 %v1402_v3, 16 }
  0x36   : > { %v358_v35 = vrot.slane %v356_v25, 1 }
  0x37   : > { %495 = vrot.lane.b32.xlu1 %v1647_v21, %s1704_s21  ;;  %493 = vrot.lane.b32.xlu0 %v1648_v26, %s1704_s21  ;;  %v1002_v21 = vor.u32 %v1001_v16, %v997_v15  ;;  %v1904_v26 = vld [vmem:[%s1750_s20 + $0x20] sm:$0xf]  ;;  %v1011_v15 = vshrl.u32 %v1501_v50, 16  ;;  %v1015_v16 = vrot.slane %v1013_v61, 1 }
  0x38   : > { %v1400_v31 = vcombine.low %v1904_v26, %v227_v27  ;;  %v1502_v27 = vcombine.low %v1948_v8, %v1486_v12 }
  0x3a   : > { %v342_v37 = vshll.u32 %v1400_v31, 16  ;;  %v340_v51 = vshrl.u32 %v1400_v31, 16  ;;  %v1018_v47 = vshrl.u32 %v1502_v27, 16 }
  0x3b   : > { %603 = vrot.lane.b32.xlu1 %v578_v30, %s1705_s22  ;;  %601 = vrot.lane.b32.xlu0 %v571_v34, %s1705_s22  ;;  %v1662_v30 = vld [vmem:[%s1750_s20 + $0x68] ss:$0 sps:$4 sm:$0xff]   ;;  %v1664_v34 = vld [vmem:[%s1750_s20 + $0x70] ss:$0 sps:$4 sm:$0xff]  }
  0x3f   : > { %607 = vrot.lane.b32.xlu1 %v592_v42, %s1705_s22  ;;  %605 = vrot.lane.b32.xlu0 %v585_v44, %s1705_s22  ;;  %v1922_v42 = vld [vmem:[%s1750_s20 + $0x28] sm:$0xf]  ;;  %v1665_v44 = vld [vmem:[%s1750_s20 + $0x80] ss:$0 sps:$4 sm:$0xff]  }
  0x40   : > { %v1500_v54 = vcombine.low %v1922_v42, %v1484_v43 }
  0x42   : > { %v1006_v2 = vshll.u32 %v1500_v54, 16 }
  0x43   : > { %921 = vrot.lane.b32.xlu1 %v1653_v53, %s1704_s21  ;;  %919 = vrot.lane.b32.xlu0 %v1654_v56, %s1704_s21  ;;  %v344_v53 = vrot.slane %v342_v37, 1  ;;  %v230_v56 = vld [vmem:[%s1750_s20 + $0x3c] sm:$0x1]  ;;  %v1020_v37 = vshll.u32 %v1502_v27, 16 }
  0x45   : > { %v345_v1 = vor.u32 %v344_v53, %v340_v51  ;;  %v1022_v48 = vrot.slane %v1020_v37, 1 }
  0x47   : > { %925 = vrot.lane.b32.xlu1 %v1655_v63, %s1704_s21  ;;  %923 = vrot.lane.b32.xlu0 %v1656_v4, %s1704_s21  ;;  %v1403_v63 = vcombine.low %v1932_v55, %v230_v56  ;;  %v1944_v4 = vld [vmem:[%s1750_s20 + $0x40] sm:$0xf]  ;;  %v1023_v51 = vor.u32 %v1022_v48, %v1018_v47 }
  0x48   : > { %v1503_v18 = vcombine.low %v1944_v4, %v1487_v5 }
  0x49   : > { %v361_v29 = vshrl.u32 %v1403_v63, 16 }
  0x4a   : > { %v1027_v31 = vshll.u32 %v1503_v18, 16  ;;  %v1025_v43 = vshrl.u32 %v1503_v18, 16 }
  0x4b   : > { %1033 = vrot.lane.b32.xlu1 %v988_v13, %s1705_s22  ;;  %1031 = vrot.lane.b32.xlu0 %v981_v17, %s1705_s22  ;;  %v1669_v13 = vld [vmem:[%s1750_s20 + $0x88] ss:$0 sps:$4 sm:$0xff]   ;;  %v363_v17 = vshll.u32 %v1403_v63, 16 }
  0x4f   : > { %1037 = vrot.lane.b32.xlu1 %v1002_v21, %s1705_s22  ;;  %1035 = vrot.lane.b32.xlu0 %v995_v22, %s1705_s22  ;;  %v1004_v21 = vshrl.u32 %v1500_v54, 16  ;;  %v1008_v22 = vrot.slane %v1006_v2, 1 }
  0x53   : > { %265 = vrot.lane.b32.xlu1 %v1661_v28, %s1704_s21  ;;  %263 = vrot.lane.b32.xlu0 %v1662_v30, %s1704_s21  ;;  %v1016_v28 = vor.u32 %v1015_v16, %v1011_v15  ;;  %v365_v30 = vrot.slane %v363_v17, 1 }
  0x55   : > { %v366_v41 = vor.u32 %v365_v30, %v361_v29 }
  0x57   : > { %929 = vrot.lane.b32.xlu1 %v1663_v32, %s1704_s21  ;;  %927 = vrot.lane.b32.xlu0 %v1664_v34, %s1704_s21  ;;  %v1009_v32 = vor.u32 %v1008_v22, %v1004_v21  ;;  %v354_v34 = vshrl.u32 %v1402_v3, 16 }
  0x5b   : > { %269 = vrot.lane.b32.xlu1 %v1665_v44, %s1704_s21  ;;  %267 = vrot.lane.b32.xlu0 %v1666_v45, %s1704_s21  ;;  %v1029_v44 = vrot.slane %v1027_v31, 1  ;;  %v359_v45 = vor.u32 %v358_v35, %v354_v34 }
  0x5d   : > { %v1030_v50 = vor.u32 %v1029_v44, %v1025_v43 }
  0x5f   : > { %377 = vrot.lane.b32.xlu1 %v352_v60, %s1705_s22  ;;  %375 = vrot.lane.b32.xlu0 %v345_v1, %s1705_s22 }
  0x63   : > { %933 = vrot.lane.b32.xlu1 %v1669_v13, %s1704_s21  ;;  %931 = vrot.lane.b32.xlu0 %v1670_v19, %s1704_s21 }
  0x67   : > { %1041 = vrot.lane.b32.xlu1 %v1016_v28, %s1705_s22  ;;  %1039 = vrot.lane.b32.xlu0 %v1009_v32, %s1705_s22 }
  0x6b   : > { %381 = vrot.lane.b32.xlu1 %v366_v41, %s1705_s22  ;;  %379 = vrot.lane.b32.xlu0 %v359_v45, %s1705_s22 }
  0x6f   : > { %1045 = vrot.lane.b32.xlu1 %v1030_v50, %s1705_s22  ;;  %1043 = vrot.lane.b32.xlu0 %v1023_v51, %s1705_s22 }
  0x85   : > { %v482_v53 = vpop.permute.xlu1 %481  ;;  %v256_v54 = vpop.permute.xlu0 %255 }
  0x86   : > { %v386_v5 = vsel %vm383_vm1, %v1767_v9, %v256_v54  ;;  %v611_v19 = vsel %vm383_vm1, %v1777_v14, %v482_v53 }
  0x89   : > { %v484_v56 = vpop.permute.xlu1 %483  ;;  %v258_v58 = vpop.permute.xlu0 %257 }
  0x8a   : > { %v389_v2 = vsel %vm383_vm1, %v1761_v6, %v258_v58  ;;  %v614_v17 = vsel %vm383_vm1, %v1771_v11, %v484_v56 }
  0x8d   : > { %v262_v60 = vpop.permute.xlu1 %261  ;;  %v260_v61 = vpop.permute.xlu0 %259 }
  0x8e   : > { %v395_v25 = vsel %vm383_vm1, %v1784_v20, %v262_v60  ;;  %v392_v28 = vsel %vm383_vm1, %v1788_v24, %v260_v61 }
  0x91   : > { %v488_v63 = vpop.permute.xlu1 %487  ;;  %v486_v1 = vpop.permute.xlu0 %485 }
  0x92   : > { %v620_v31 = vsel %vm383_vm1, %v1796_v33, %v488_v63  ;;  %v617_v34 = vsel %vm383_vm1, %v1801_v36, %v486_v1 }
  0x95   : > { %v370_v3 = vpop.permute.xlu1 %369  ;;  %v368_v13 = vpop.permute.xlu0 %367 }
  0x96   : > { %v412_v12 = vsel %vm408_vm2, %v389_v2, %v370_v3  ;;  %v410_v15 = vsel %vm408_vm2, %v386_v5, %v368_v13 }
  0x97   : > { %v1455_v16 = vcombine.low %v410_v15, %v412_v12 }
  0x99   : > { %v596_v18 = vpop.permute.xlu1 %595  ;;  %1562 = vmatprep.mubr.msk.bf16.mxu0 %vm677_vm3, %v1455_v16  ;;  %v594_v21 = vpop.permute.xlu0 %593 }
  0x9a   : > { %v636_v6 = vsel %vm408_vm2, %v614_v17, %v596_v18  ;;  %v634_v9 = vsel %vm408_vm2, %v611_v19, %v594_v21 }
  0x9b   : > { %v1446_v22 = vcombine.low %v634_v9, %v636_v6 }
  0x9d   : > { %v374_v27 = vpop.permute.xlu1 %373  ;;  %1552 = vmatprep.mubr.msk.bf16.mxu1 %vm677_vm3, %v1446_v22  ;;  %v372_v14 = vpop.permute.xlu0 %371 }
  0x9e   : > { %v416_v11 = vsel %vm408_vm2, %v395_v25, %v374_v27  ;;  %v414_v29 = vsel %vm408_vm2, %v392_v28, %v372_v14 }
  0x9f   : > { %v1456_v30 = vcombine.low %v414_v29, %v416_v11 }
  0xa1   : > { %v600_v32 = vpop.permute.xlu1 %599  ;;  %1563 = vmatmul.mubr.msk.bf16.vlgmr.msra.gmra.mrb[0].mxu0 %vm677_vm3, %v1456_v30  ;;  %v598_v24 = vpop.permute.xlu0 %597 }
  0xa2   : > { %v640_v20 = vsel %vm408_vm2, %v620_v31, %v600_v32  ;;  %v638_v35 = vsel %vm408_vm2, %v617_v34, %v598_v24  ;;  %1571 = vmatpush3.bf16.msra.mxu0 %v1888_v62 }
  0xa3   : > { %v1447_v37 = vcombine.low %v638_v35, %v640_v20 }
  0xa5   : > { %v492_v41 = vpop.permute.xlu1 %491  ;;  %1553 = vmatmul.mubr.msk.bf16.vlgmr.msra.gmra.mrb[0].mxu1 %vm677_vm3, %v1447_v37  ;;  %v490_v43 = vpop.permute.xlu0 %489 }
  0xa6   : > { %1581 = vmatpush3.bf16.msra.mxu1 %v1872_v52  ;;  %v626_v36 = vsel %vm383_vm1, %v1812_v59, %v492_v41  ;;  %v623_v47 = vsel %vm383_vm1, %v1817_v0, %v490_v43 }
  0xa9   : > { %v496_v33 = vpop.permute.xlu1 %495  ;;  %v494_v44 = vpop.permute.xlu0 %493 }
  0xaa   : > { %v632_v53 = vsel %vm383_vm1, %v1825_v7, %v496_v33  ;;  %v629_v52 = vsel %vm383_vm1, %v1829_v10, %v494_v44 }
  0xad   : > { %v604_v45 = vpop.permute.xlu1 %603  ;;  %v602_v50 = vpop.permute.xlu0 %601 }
  0xae   : > { %v644_v48 = vsel %vm408_vm2, %v626_v36, %v604_v45  ;;  %v642_v62 = vsel %vm408_vm2, %v623_v47, %v602_v50 }
  0xaf   : > { %v1448_v51 = vcombine.low %v642_v62, %v644_v48 }
  0xb1   : > { %v608_v54 = vpop.permute.xlu1 %607  ;;  %1556 = vmatprep.mubr.msk.bf16.mxu1 %vm677_vm3, %v1448_v51  ;;  %v606_v59 = vpop.permute.xlu0 %605 }
  0xb2   : > { %v648_v56 = vsel %vm408_vm2, %v632_v53, %v608_v54  ;;  %v646_v0 = vsel %vm408_vm2, %v629_v52, %v606_v59 }
  0xb3   : > { %v1449_v58 = vcombine.low %v646_v0, %v648_v56 }
  0xb5   : > { %v922_v60 = vpop.permute.xlu1 %921  ;;  %1557 = vmatmul.mubr.msk.bf16.gmra.mrb[4].mxu1 %vm677_vm3, %v1449_v58  ;;  %v920_v61 = vpop.permute.xlu0 %919 }
  0xb6   : > { %v1052_v7 = vsel %vm383_vm1, %v1845_v38, %v922_v60  ;;  %v1049_v10 = vsel %vm383_vm1, %v1849_v40, %v920_v61 }
  0xb9   : > { %v926_v63 = vpop.permute.xlu1 %925  ;;  %v924_v1 = vpop.permute.xlu0 %923 }
  0xba   : > { %v1058_v15 = vsel %vm383_vm1, %v1857_v46, %v926_v63  ;;  %v1055_v17 = vsel %vm383_vm1, %v1864_v49, %v924_v1 }
  0xbd   : > { %v1034_v2 = vpop.permute.xlu1 %1033  ;;  %v1032_v5 = vpop.permute.xlu0 %1031 }
  0xbe   : > { %v1074_v3 = vsel %vm408_vm2, %v1052_v7, %v1034_v2  ;;  %v1072_v12 = vsel %vm408_vm2, %v1049_v10, %v1032_v5 }
  0xbf   : > { %v1506_v13 = vcombine.low %v1072_v12, %v1074_v3 }
  0xc1   : > { %v1038_v16 = vpop.permute.xlu1 %1037  ;;  %1572 = vmatprep.mubr.msk.bf16.mxu0 %vm677_vm3, %v1506_v13  ;;  %v1036_v38 = vpop.permute.xlu0 %1035 }
  0xc2   : > { %v1078_v18 = vsel %vm408_vm2, %v1058_v15, %v1038_v16  ;;  %v1076_v40 = vsel %vm408_vm2, %v1055_v17, %v1036_v38 }
  0xc3   : > { %v1507_v19 = vcombine.low %v1076_v40, %v1078_v18 }
  0xc5   : > { %v266_v6 = vpop.permute.xlu1 %265  ;;  %1573 = vmatmul.mubr.msk.bf16.vlgmr.msra.gmra.mrb[0].mxu0 %vm677_vm3, %v1507_v19  ;;  %v264_v21 = vpop.permute.xlu0 %263 }
  0xc6   : > { %v401_v27 = vsel %vm383_vm1, %v1900_v23, %v266_v6  ;;  %v398_v28 = vsel %vm383_vm1, %v1904_v26, %v264_v21 }
  0xc9   : > { %v930_v9 = vpop.permute.xlu1 %929  ;;  %v928_v22 = vpop.permute.xlu0 %927 }
  0xca   : > { %v1064_v34 = vsel %vm383_vm1, %v1918_v39, %v930_v9  ;;  %v1061_v23 = vsel %vm383_vm1, %v1922_v42, %v928_v22 }
  0xcd   : > { %v270_v25 = vpop.permute.xlu1 %269  ;;  %v268_v46 = vpop.permute.xlu0 %267 }
  0xce   : > { %v407_v41 = vsel %vm383_vm1, %v1932_v55, %v270_v25  ;;  %v404_v33 = vsel %vm383_vm1, %v1936_v57, %v268_v46 }
  0xd1   : > { %v378_v49 = vpop.permute.xlu1 %377  ;;  %v376_v14 = vpop.permute.xlu0 %375 }
  0xd2   : > { %v420_v11 = vsel %vm408_vm2, %v401_v27, %v378_v49  ;;  %v418_v29 = vsel %vm408_vm2, %v398_v28, %v376_v14 }
  0xd3   : > { %v1457_v30 = vcombine.low %v418_v29, %v420_v11 }
  0xd5   : > { %v934_v31 = vpop.permute.xlu1 %933  ;;  %1566 = vmatprep.mubr.msk.bf16.mxu1 %vm677_vm3, %v1457_v30  ;;  %v932_v32 = vpop.permute.xlu0 %931 }
  0xd6   : > { %v1070_v45 = vsel %vm383_vm1, %v1944_v4, %v934_v31  ;;  %v1067_v55 = vsel %vm383_vm1, %v1948_v8, %v932_v32  ;;  %v1515_v8 = vld [vmem:[%s2088_s2] ss:$0 sm:$0xff] }
  0xd9   : > { %v1042_v20 = vpop.permute.xlu1 %1041  ;;  %v1040_v26 = vpop.permute.xlu0 %1039 }
  0xda   : > { %v1082_v24 = vsel %vm408_vm2, %v1064_v34, %v1042_v20  ;;  %v1080_v35 = vsel %vm408_vm2, %v1061_v23, %v1040_v26 }
  0xdb   : > { %v1508_v37 = vcombine.low %v1080_v35, %v1082_v24 }
  0xdd   : > { %v382_v43 = vpop.permute.xlu1 %381  ;;  %1576 = vmatprep.mubr.msk.bf16.mxu0 %vm677_vm3, %v1508_v37  ;;  %v380_v39 = vpop.permute.xlu0 %379 }
  0xde   : > { %v424_v44 = vsel %vm408_vm2, %v407_v41, %v382_v43  ;;  %v422_v42 = vsel %vm408_vm2, %v404_v33, %v380_v39 }
  0xdf   : > { %v1458_v36 = vcombine.low %v422_v42, %v424_v44 }
  0xe1   : > { %v1046_v47 = vpop.permute.xlu1 %1045  ;;  %1567 = vmatmul.mubr.msk.bf16.vlgmr.msra.gmra.mrb[4].mxu1 %vm677_vm3, %v1458_v36  ;;  %v1044_v57 = vpop.permute.xlu0 %1043 }
  0xe2   : > { %v1086_v48 = vsel %vm408_vm2, %v1070_v45, %v1046_v47  ;;  %v1084_v50 = vsel %vm408_vm2, %v1067_v55, %v1044_v57 }
  0xe3   : > { %v1509_v62 = vcombine.low %v1084_v50, %v1086_v48 }
  0xe5   : > { %1577 = vmatmul.mubr.msk.bf16.gmra.mrb[4].mxu0 %vm677_vm3, %v1509_v62 }
 0x178   : > { %v1554_v51 = vpop.f32.mrb[0].mxu1 }
 0x179   : > { %v728_v53 = vpop.f32.mrb[1].mxu1 }
 0x17a   : > { %v1555_v54 = vpop.f32.mrb[2].mxu1 }
 0x17b   : > { %v731_v52 = vpop.f32.mrb[3].mxu1 }
 0x198   : > { %v1574_v4 = vpop.f32.mrb[0].mxu0 }
 0x199   : > { %v1582_v56 = vadd.f32 %v1574_v4, %v1554_v51  ;;  %v1164_v59 = vpop.f32.mrb[1].mxu0 }
 0x19a   : > { %v1583_v0 = vadd.f32 %v1164_v59, %v728_v53  ;;  %v1575_v58 = vpop.f32.mrb[2].mxu0 }
 0x19b   : > { %v1212_v60 = vadd.f32 %v1582_v56, %v1515_v8  ;;  %v1584_v61 = vadd.f32 %v1575_v58, %v1555_v54  ;;  %v1167_v63 = vpop.f32.mrb[3].mxu0 }
 0x19c   : > { %v1210_v1 = vadd.f32 %v1583_v0, %v1515_v8  ;;  %v1585_v7 = vadd.f32 %v1167_v63, %v731_v52 }
 0x19d   : > { %v1220_v2 = vmax.f32 %v1212_v60, 0.0  ;;  %v1213_v10 = vadd.f32 %v1584_v61, %v1515_v8 }
 0x19e   : > { %v1218_v3 = vmax.f32 %v1210_v1, 0.0  ;;  %v1211_v5 = vadd.f32 %v1585_v7, %v1515_v8 }
 0x19f   : > { %v1529_v12 = vpack.c.bf16 %v1220_v2, %v1220_v2  ;;  %v1221_v13 = vmax.f32 %v1213_v10, 0.0 }
 0x1a0   : > { %v1527_v15 = vpack.c.bf16 %v1218_v3, %v1218_v3  ;;  %v1219_v16 = vmax.f32 %v1211_v5, 0.0 }
 0x1a1   : > { %1261 = vst.msk [vmem:[%s2059_s7 + $0x8] sm:$0xf] %vm1258_vm4, %v1529_v12  ;;  %v1530_v17 = vpack.c.bf16 %v1221_v13, %v1221_v13 }
 0x1a2   : > { %1259 = vst.msk [vmem:[%s2059_s7] sm:$0xf] %vm1258_vm4, %v1527_v15  ;;  %v1528_v18 = vpack.c.bf16 %v1219_v16, %v1219_v16 }
 0x1a3   : > { %1262 = vst.msk [vmem:[%s2059_s7 + $0xc] sm:$0xf] %vm1258_vm4, %v1530_v17 }
 0x1a4   : > { %1260 = vst.msk [vmem:[%s2059_s7 + $0x4] sm:$0xf] %vm1258_vm4, %v1528_v18 }
 0x1b4   : > { %v1568_v38 = vpop.f32.mrb[4].mxu1 }
 0x1b5   : > { %v849_v40 = vpop.f32.mrb[5].mxu1 }
 0x1b6   : > { %v1569_v19 = vpop.f32.mrb[6].mxu1 }
 0x1b7   : > { %v852_v6 = vpop.f32.mrb[7].mxu1 }
 0x1b8   : > { %v1578_v21 = vpop.f32.mrb[4].mxu0 }
 0x1b9   : > { %v1586_v9 = vadd.f32 %v1578_v21, %v1568_v38  ;;  %v1180_v22 = vpop.f32.mrb[5].mxu0 }
 0x1ba   : > { %v1587_v25 = vadd.f32 %v1180_v22, %v849_v40  ;;  %v1579_v46 = vpop.f32.mrb[6].mxu0 }
 0x1bb   : > { %v1216_v27 = vadd.f32 %v1586_v9, %v1515_v8  ;;  %v1588_v49 = vadd.f32 %v1579_v46, %v1569_v19  ;;  %v1183_v28 = vpop.f32.mrb[7].mxu0 }
 0x1bc   : > { %v1214_v11 = vadd.f32 %v1587_v25, %v1515_v8  ;;  %v1589_v14 = vadd.f32 %v1183_v28, %v852_v6 }
 0x1bd   : > { %v1224_v29 = vmax.f32 %v1216_v27, 0.0  ;;  %v1217_v30 = vadd.f32 %v1588_v49, %v1515_v8 }
 0x1be   : > { %v1222_v31 = vmax.f32 %v1214_v11, 0.0  ;;  %v1215_v32 = vadd.f32 %v1589_v14, %v1515_v8 }
 0x1bf   : > { %v1533_v34 = vpack.c.bf16 %v1224_v29, %v1224_v29  ;;  %v1225_v20 = vmax.f32 %v1217_v30, 0.0 }
 0x1c0   : > { %v1531_v23 = vpack.c.bf16 %v1222_v31, %v1222_v31  ;;  %v1223_v24 = vmax.f32 %v1215_v32, 0.0 }
 0x1c1   : > { %1265 = vst.msk [vmem:[%s2059_s7 + $0x18] sm:$0xf] %vm1258_vm4, %v1533_v34  ;;  %v1534_v26 = vpack.c.bf16 %v1225_v20, %v1225_v20 }
 0x1c2   : > { %1263 = vst.msk [vmem:[%s2059_s7 + $0x10] sm:$0xf] %vm1258_vm4, %v1531_v23  ;;  %v1532_v35 = vpack.c.bf16 %v1223_v24, %v1223_v24 }
 0x1c3   : > { %1266 = vst.msk [vmem:[%s2059_s7 + $0x1c] sm:$0xf] %vm1258_vm4, %v1534_v26 }
 0x1c4   : > { %1264 = vst.msk [vmem:[%s2059_s7 + $0x14] sm:$0xf] %vm1258_vm4, %v1532_v35 }
 0x1c5 PF: > { %s13_s14 = sadd.s32 1, %s1702_s14   ;;  %s2090_s12 = smov %s1698_s13 }
 0x1c6   : > { %p10_p6 = scmp.ge.s32.totalorder %s13_s14, 4   ;;  %s2091_s13 = smov %s2093_s15 }
 0x1c8   :  { %12 = sbr.rel (!%p10_p6) target bundleno = 2 (0x2), region = 70 }

// kernel: block_forward.5
= control target key start
LH: loop header
LB: loop body
LE: loop exit
PB: predicated region body
PF: predicated region fallthrough
CT: control target
= control target key end

     0   :  { %s1797_s15 = smov 0   ;;  %s1799_s16 = smov 0   ;;  %s2270_s0 = inlined_call_operand.vmem [shape: bf16[2,10,10,8], index: 0, kind: input, shape index: {}]   ;;  %s2271_s1 = inlined_call_operand.vmem [shape: bf16[3,24,8], index: 1, kind: input, shape index: {}]   ;;  %s2272_s2 = inlined_call_operand.vmem [shape: f32[1,8], index: 2, kind: input, shape index: {}]   ;;  %s2273_s3 = inlined_call_operand.vmem [shape: f32[2,64,8], index: 3, kind: input, shape index: {}]   ;;  %s2274_s4 = inlined_call_operand.vmem [shape: f32[2,64,8], index: 4, kind: output, shape index: {}]  }
   0x1   :  { %s1801_s17 = smov 0  }
   0x2 LB: > { %s26_s18 = sadd.s32 1, %s1764_s16  ;;  %p1444_p0 = scmp.ge.s32.totalorder %s1768_s17, 1  ;;  %s1768_s17 = sphi %s1801_s17, %s14_s17   ;;  %s1764_s16 = sphi %s1799_s16, %s2276_s16   ;;  %s1760_s15 = sphi %s1797_s15, %s2275_s15  }
   0x3   : > { %p28_p1 = scmp.ge.s32.totalorder %s26_s18, 2  ;;  %p193_p2 = scmp.lt.s32.totalorder %s1768_s17, 3 }
   0x5   : > { %s2278_s18 = smov (%p28_p1, %s26_s18), 0  ;;  %p194_p3 = pnand %p1444_p0, %p193_p2 }
   0x6   : > { %p232_p4 = scmp.lt.s32.totalorder (!%p194_p3), %s1760_s15, 1  ;;  %s1770_s23 = smov (!%p194_p3), 16   ;;  %v1889_v48 = vld [vmem:[%s2271_s1] sm:$0xff] (!%p194_p3)   ;;  %v1741_v57 = vld [vmem:[%s2271_s1 + $0xc] sm:$0xff] (!%p194_p3)   ;;  %vm765_vm0 = vcmask (!%p194_p3), 1043456   ;;  %vm446_vm1 = vcmask (!%p194_p3), 64512  }
   0x7   : > { %197 = sbr.rel (%p194_p3) target bundleno = 457 (0x1c9), region = 36  ;;  %s1771_s24 = smov (!%p194_p3), 8   ;;  %1617 = vmatprep.subr.bf16.mxu0 (!%p194_p3), %v1889_v48  ;;  %1605 = vmatprep.subr.bf16.mxu1 (!%p194_p3), %v1741_v57  ;;  %vm471_vm2 = vcmask (!%p194_p3), 130048   ;;  %vm752_vm3 = vcmask (!%p194_p3), 195584  }
   0x8   : > { %1618 = vmatpush3.bf16.msra.mxu0 (!%p194_p3), %v1889_v48  ;;  %1606 = vmatpush3.bf16.msra.mxu1 (!%p194_p3), %v1741_v57 }
   0xe   : > { %s2280_s15 = smov (!%p232_p4, %s1760_s15), 1 }
   0xf   : > { %s1665_s19 = smul.u32 80, %s2280_s15  ;;  %s1585_s11 = sshll.u32 %s2280_s15, 6 }
  0x10   : > { %s2227_s14 = scalar_lea.vmem %s2273_s3, %s1585_s11 }
  0x11   : > { %s1821_s22 = scalar_lea.vmem %s2270_s0, %s1665_s19 }
  0x12   : > { %v271_v0 = vld [vmem:[%s1821_s22 + $0xc] sm:$0x1]  ;;  %v279_v1 = vld [vmem:[%s1821_s22 + $0x8] sm:$0xe]  ;;  %v270_v5 = vld [vmem:[%s1821_s22 + $0x4] sm:$0x1] }
  0x13   : > { %v1826_v2 = vld [vmem:[%s1821_s22 + $0x8] sm:$0xf]  ;;  %v1459_v3 = vcombine.low %v279_v1, %v271_v0  ;;  %v278_v6 = vld [vmem:[%s1821_s22] sm:$0xe]  ;;  %v1839_v11 = vld [vmem:[%s1821_s22 + $0xc] sm:$0x1] }
  0x14   : > { %v1451_v4 = vcombine.low %v1826_v2, %v271_v0  ;;  %v1832_v7 = vld [vmem:[%s1821_s22] sm:$0xf]  ;;  %v1458_v8 = vcombine.low %v278_v6, %v270_v5  ;;  %v1836_v10 = vld [vmem:[%s1821_s22 + $0x8] sm:$0xf]  ;;  %v1842_v12 = vld [vmem:[%s1821_s22 + $0x10] sm:$0xf] }
  0x15   : > { %v1450_v9 = vcombine.low %v1832_v7, %v270_v5  ;;  %v423_v13 = vrot.slane %v1459_v3, 1  ;;  %v1490_v15 = vcombine.low %v1836_v10, %v1839_v11  ;;  %v1847_v16 = vld [vmem:[%s1821_s22 + $0x14] sm:$0x1]  ;;  %v1852_v21 = vld [vmem:[%s1821_s22 + $0x18] sm:$0xf] }
  0x16   : > { %v336_v14 = vshll.u32 %v1451_v4, 16  ;;  %v422_v17 = vrot.slane %v1458_v8, 1  ;;  %v1491_v20 = vcombine.low %v1842_v12, %v1847_v16  ;;  %v334_v24 = vshrl.u32 %v1451_v4, 16  ;;  %v1856_v26 = vld [vmem:[%s1821_s22 + $0x1c] sm:$0x1] }
  0x17   : > { %v329_v18 = vshll.u32 %v1450_v9, 16  ;;  %v327_v19 = vshrl.u32 %v1450_v9, 16  ;;  %432 = vrot.lane.b32.xlu1 %v423_v13, %s1770_s23  ;;  %v560_v22 = vshrl.u32 %v1490_v15, 16  ;;  %v562_v23 = vshll.u32 %v1490_v15, 16  ;;  %v1862_v31 = vld [vmem:[%s1821_s22 + $0x10] sm:$0xf] }
  0x18   : > { %v338_v25 = vrot.slane %v336_v14, 1  ;;  %430 = vrot.lane.b32.xlu0 %v422_v17, %s1770_s23  ;;  %v567_v28 = vshrl.u32 %v1491_v20, 16  ;;  %v569_v29 = vshll.u32 %v1491_v20, 16  ;;  %v1453_v30 = vcombine.low %v1852_v21, %v1856_v26  ;;  %v1865_v33 = vld [vmem:[%s1821_s22 + $0x14] sm:$0x1] }
  0x19   : > { %v331_v27 = vrot.slane %v329_v18, 1  ;;  %v564_v32 = vrot.slane %v562_v23, 1  ;;  %v1868_v34 = vld [vmem:[%s1821_s22 + $0x20] sm:$0xf]  ;;  %v1871_v38 = vld [vmem:[%s1821_s22 + $0x24] sm:$0x1]  ;;  %v1452_v40 = vcombine.low %v1862_v31, %v1865_v33 }
  0x1a   : > { %v571_v36 = vrot.slane %v569_v29, 1  ;;  %v350_v37 = vshll.u32 %v1453_v30, 16  ;;  %v1493_v41 = vcombine.low %v1868_v34, %v1871_v38  ;;  %v1878_v42 = vld [vmem:[%s1821_s22 + $0x18] sm:$0xf]  ;;  %v1881_v43 = vld [vmem:[%s1821_s22 + $0x1c] sm:$0x1]  ;;  %v339_v45 = vor.u32 %v338_v25, %v334_v24 }
  0x1b   : > { %v332_v35 = vor.u32 %v331_v27, %v327_v19  ;;  %v565_v39 = vor.u32 %v564_v32, %v560_v22  ;;  %v348_v46 = vshrl.u32 %v1453_v30, 16  ;;  %v1492_v47 = vcombine.low %v1878_v42, %v1881_v43  ;;  %v1483_v62 = vld [vmem:[%s1821_s22 + $0x10] sm:$0xe]  ;;  %v1482_v63 = vld [vmem:[%s1821_s22 + $0x8] sm:$0xe] }
  0x1c   : > { %v572_v44 = vor.u32 %v571_v36, %v567_v28  ;;  %v352_v49 = vrot.slane %v350_v37, 1  ;;  %v341_v50 = vshrl.u32 %v1452_v40, 16  ;;  %v343_v51 = vshll.u32 %v1452_v40, 16  ;;  %v280_v5 = vld [vmem:[%s1821_s22 + $0x10] sm:$0xe] }
  0x1d   : > { %382 = vrot.lane.b32.xlu0 %v332_v35, %s1771_s24  ;;  %615 = vrot.lane.b32.xlu1 %v565_v39, %s1771_s24  ;;  %v583_v52 = vshll.u32 %v1493_v41, 16  ;;  %v576_v53 = vshll.u32 %v1492_v47, 16  ;;  %v574_v55 = vshrl.u32 %v1492_v47, 16  ;;  %v581_v60 = vshrl.u32 %v1493_v41, 16  ;;  %v1907_v6 = vld [vmem:[%s1821_s22 + $0x28] sm:$0xf] }
  0x1e   : > { %v345_v54 = vrot.slane %v343_v51, 1  ;;  %v353_v58 = vor.u32 %v352_v49, %v348_v46  ;;  %v1499_v1 = vcombine.low %v1483_v62, %v1847_v16  ;;  %v1498_v3 = vcombine.low %v1482_v63, %v1839_v11  ;;  %v1910_v8 = vld [vmem:[%s1821_s22 + $0x2c] sm:$0x1]  ;;  %v281_v9 = vld [vmem:[%s1821_s22 + $0x18] sm:$0xe] }
  0x1f   : > { %v578_v56 = vrot.slane %v576_v53, 1  ;;  %v585_v61 = vrot.slane %v583_v52, 1  ;;  %v1914_v13 = vld [vmem:[%s1821_s22 + $0x30] sm:$0xf]  ;;  %v1917_v14 = vld [vmem:[%s1821_s22 + $0x34] sm:$0x1]  ;;  %v1460_v16 = vcombine.low %v280_v5, %v1865_v33  ;;  %v1494_v17 = vcombine.low %v1907_v6, %v1910_v8 }
  0x20   : > { %v346_v59 = vor.u32 %v345_v54, %v341_v50  ;;  %v656_v11 = vrot.slane %v1499_v1, 1  ;;  %v655_v15 = vrot.slane %v1498_v3, 1  ;;  %v1461_v18 = vcombine.low %v281_v9, %v1856_v26  ;;  %v1484_v19 = vld [vmem:[%s1821_s22 + $0x18] sm:$0xe]  ;;  %v1932_v23 = vld [vmem:[%s1821_s22 + $0x3c] sm:$0x1] }
  0x21   : > { %384 = vrot.lane.b32.xlu0 %v339_v45, %s1771_s24  ;;  %617 = vrot.lane.b32.xlu1 %v572_v44, %s1771_s24  ;;  %v579_v0 = vor.u32 %v578_v56, %v574_v55  ;;  %v586_v4 = vor.u32 %v585_v61, %v581_v60  ;;  %v1495_v20 = vcombine.low %v1914_v13, %v1917_v14  ;;  %v1929_v22 = vld [vmem:[%s1821_s22 + $0x38] sm:$0xf]  ;;  %v1485_v24 = vld [vmem:[%s1821_s22 + $0x20] sm:$0xe]  ;;  %v424_v28 = vrot.slane %v1460_v16, 1 }
  0x22   : > { %v1936_v25 = vld [vmem:[%s1821_s22 + $0x40] sm:$0xf]  ;;  %v1939_v27 = vld [vmem:[%s1821_s22 + $0x44] sm:$0x1]  ;;  %v1500_v29 = vcombine.low %v1484_v19, %v1881_v43  ;;  %v590_v30 = vshll.u32 %v1494_v17, 16  ;;  %v1496_v26 = vcombine.low %v1929_v22, %v1932_v23  ;;  %v425_v32 = vrot.slane %v1461_v18, 1 }
  0x23   : > { %v1501_v33 = vcombine.low %v1485_v24, %v1871_v38  ;;  %v597_v35 = vshll.u32 %v1495_v20, 16  ;;  %v1497_v36 = vcombine.low %v1936_v25, %v1939_v27  ;;  %v588_v39 = vshrl.u32 %v1494_v17, 16  ;;  %v1486_v50 = vld [vmem:[%s1821_s22 + $0x28] sm:$0xe]  ;;  %v1955_v54 = vld [vmem:[%s1821_s22 + $0x10] sm:$0xf] }
  0x24   : > { %v657_v37 = vrot.slane %v1500_v29, 1  ;;  %v592_v40 = vrot.slane %v590_v30, 1  ;;  %v604_v41 = vshll.u32 %v1496_v26, 16  ;;  %v595_v44 = vshrl.u32 %v1495_v20, 16  ;;  %v1958_v55 = vld [vmem:[%s1821_s22 + $0x14] sm:$0x1] }
  0x25   : > { %386 = vrot.lane.b32.xlu0 %v346_v59, %s1771_s24  ;;  %388 = vrot.lane.b32.xlu1 %v353_v58, %s1771_s24  ;;  %v658_v43 = vrot.slane %v1501_v33, 1  ;;  %v599_v38 = vrot.slane %v597_v35, 1  ;;  %v611_v45 = vshll.u32 %v1497_v36, 16  ;;  %v602_v47 = vshrl.u32 %v1496_v26, 16  ;;  %v1487_v56 = vld [vmem:[%s1821_s22 + $0x30] sm:$0xe] }
  0x26   : > { %v593_v46 = vor.u32 %v592_v40, %v588_v39  ;;  %v606_v49 = vrot.slane %v604_v41, 1  ;;  %v609_v52 = vshrl.u32 %v1497_v36, 16  ;;  %v1962_v57 = vld [vmem:[%s1821_s22 + $0x18] sm:$0xf]  ;;  %v1965_v58 = vld [vmem:[%s1821_s22 + $0x1c] sm:$0x1]  ;;  %v1502_v60 = vcombine.low %v1486_v50, %v1910_v8 }
  0x27   : > { %v600_v51 = vor.u32 %v599_v38, %v595_v44  ;;  %v613_v53 = vrot.slane %v611_v45, 1  ;;  %v1488_v61 = vld [vmem:[%s1821_s22 + $0x38] sm:$0xe]  ;;  %v1553_v62 = vcombine.low %v1955_v54, %v1958_v55  ;;  %v1554_v1 = vcombine.low %v1962_v57, %v1965_v58  ;;  %v1977_v3 = vld [vmem:[%s1821_s22 + $0x20] sm:$0xf] }
  0x28   : > { %v607_v59 = vor.u32 %v606_v49, %v602_v47  ;;  %v1489_v5 = vld [vmem:[%s1821_s22 + $0x40] sm:$0xe]  ;;  %v1984_v9 = vld [vmem:[%s1821_s22 + $0x28] sm:$0xf]  ;;  %v1987_v8 = vld [vmem:[%s1821_s22 + $0x2c] sm:$0x1] }
  0x29   : > { %619 = vrot.lane.b32.xlu0 %v579_v0, %s1771_s24  ;;  %621 = vrot.lane.b32.xlu1 %v586_v4, %s1771_s24  ;;  %v614_v63 = vor.u32 %v613_v53, %v609_v52  ;;  %v1503_v0 = vcombine.low %v1487_v56, %v1917_v14  ;;  %v1980_v4 = vld [vmem:[%s1821_s22 + $0x24] sm:$0x1]  ;;  %v1743_v14 = vld [vmem:[%s2271_s1 + $0x14] ss:$0 sps:$4 sm:$0xff]   ;;  %v659_v16 = vrot.slane %v1502_v60, 1  ;;  %v1014_v17 = vshll.u32 %v1553_v62, 16 }
  0x2a   : > { %v1555_v18 = vcombine.low %v1977_v3, %v1980_v4  ;;  %v1505_v20 = vcombine.low %v1489_v5, %v1939_v27  ;;  %v1556_v24 = vcombine.low %v1984_v9, %v1987_v8  ;;  %v1012_v29 = vshrl.u32 %v1553_v62, 16  ;;  %1661 = vmatprep.subr.msk.bf16.mxu1 %vm765_vm0, %v1743_v14  ;;  %v2017_v33 = vld [vmem:[%s2271_s1 + $0x18] sm:$0xff]   ;;  %v1545_v44 = vld [vmem:[%s1821_s22 + $0x10] sm:$0xe]  ;;  %v2027_v47 = vld [vmem:[%s1821_s22 + $0x20] sm:$0xf] }
  0x2b   : > { %v660_v19 = vrot.slane %v1503_v0, 1  ;;  %v1016_v30 = vrot.slane %v1014_v17, 1  ;;  %v767_v27 = vsel %vm765_vm0, %v1743_v14, 0  ;;  %v1019_v36 = vshrl.u32 %v1554_v1, 16  ;;  %v2030_v49 = vld [vmem:[%s1821_s22 + $0x24] sm:$0x1] }
  0x2c   : > { %v1028_v26 = vshll.u32 %v1555_v18, 16  ;;  %v662_v35 = vrot.slane %v1505_v20, 1  ;;  %v1035_v39 = vshll.u32 %v1556_v24, 16  ;;  %1608 = vmatpush3.bf16.msra.mxu1 %v767_v27  ;;  %v1026_v41 = vshrl.u32 %v1555_v18, 16  ;;  %v1546_v50 = vld [vmem:[%s1821_s22 + $0x18] sm:$0xe] }
  0x2d   : > { %663 = vrot.lane.b32.xlu0 %v655_v15, %s1770_s23  ;;  %665 = vrot.lane.b32.xlu1 %v656_v11, %s1770_s23  ;;  %v1504_v11 = vcombine.low %v1488_v61, %v1932_v23  ;;  %v1993_v15 = vld [vmem:[%s2271_s1 + $0x8] ss:$0 sps:$4 sm:$0xff]   ;;  %v1021_v23 = vshll.u32 %v1554_v1, 16  ;;  %v1017_v40 = vor.u32 %v1016_v30, %v1012_v29  ;;  %v1033_v45 = vshrl.u32 %v1556_v24, 16  ;;  %v2037_v52 = vld [vmem:[%s1821_s22 + $0x2c] sm:$0x1] }
  0x2e   : > { %1662 = vmatprep.subr.msk.bf16.mxu0 %vm765_vm0, %v1993_v15  ;;  %1641 = vmatprep.subr.bf16.mxu1 %v1889_v48  ;;  %v1561_v56 = vcombine.low %v1545_v44, %v1958_v55  ;;  %v1547_v60 = vld [vmem:[%s1821_s22 + $0x20] sm:$0xe]  ;;  %v1454_v61 = vcombine.low %v2027_v47, %v2030_v49  ;;  %v2050_v1 = vld [vmem:[%s1821_s22 + $0x30] sm:$0xf]  ;;  %v2053_v5 = vld [vmem:[%s1821_s22 + $0x34] sm:$0x1] }
  0x2f   : > { %v2056_v55 = vld [vmem:[%s1821_s22 + $0x38] sm:$0xf]  ;;  %v1557_v18 = vcombine.low %v2050_v1, %v2053_v5  ;;  %v2070_v24 = vld [vmem:[%s1821_s22 + $0x30] sm:$0xf] }
  0x30   : > { %v357_v17 = vshll.u32 %v1454_v61, 16 }
  0x31   : > { %434 = vrot.lane.b32.xlu0 %v424_v28, %s1770_s23  ;;  %436 = vrot.lane.b32.xlu1 %v425_v32, %s1770_s23  ;;  %v661_v28 = vrot.slane %v1504_v11, 1  ;;  %v2011_v32 = vsel %vm765_vm0, %v1993_v15, 0  ;;  %v2059_v11 = vld [vmem:[%s1821_s22 + $0x3c] sm:$0x1] }
  0x32   : > { %1620 = vmatpush3.bf16.msra.mxu0 %v2011_v32  ;;  %v359_v27 = vrot.slane %v357_v17, 1 }
  0x33   : > { %1629 = vmatprep.subr.bf16.mxu0 %v2017_v33 }
  0x35   : > { %667 = vrot.lane.b32.xlu0 %v657_v37, %s1770_s23  ;;  %669 = vrot.lane.b32.xlu1 %v658_v43, %s1770_s23  ;;  %v1023_v37 = vrot.slane %v1021_v23, 1  ;;  %v1030_v43 = vrot.slane %v1028_v26, 1  ;;  %v1558_v23 = vcombine.low %v2056_v55, %v2059_v11  ;;  %v355_v26 = vshrl.u32 %v1454_v61, 16  ;;  %v2094_v61 = vld [vmem:[%s1821_s22 + $0x48] sm:$0xf] }
  0x37   : > { %v1024_v38 = vor.u32 %v1023_v37, %v1019_v36  ;;  %v1031_v53 = vor.u32 %v1030_v43, %v1026_v41  ;;  %v1047_v43 = vshrl.u32 %v1558_v23, 16  ;;  %v360_v44 = vor.u32 %v359_v27, %v355_v26 }
  0x39   : > { %623 = vrot.lane.b32.xlu0 %v593_v46, %s1771_s24  ;;  %625 = vrot.lane.b32.xlu1 %v600_v51, %s1771_s24  ;;  %v1037_v46 = vrot.slane %v1035_v39, 1  ;;  %v2034_v51 = vld [vmem:[%s1821_s22 + $0x28] sm:$0xf] }
  0x3a   : > { %v1455_v0 = vcombine.low %v2034_v51, %v2037_v52 }
  0x3b   : > { %v1038_v62 = vor.u32 %v1037_v46, %v1033_v45 }
  0x3c   : > { %v364_v20 = vshll.u32 %v1455_v0, 16  ;;  %v362_v37 = vshrl.u32 %v1455_v0, 16 }
  0x3d   : > { %627 = vrot.lane.b32.xlu0 %v607_v59, %s1771_s24  ;;  %629 = vrot.lane.b32.xlu1 %v614_v63, %s1771_s24  ;;  %v1548_v59 = vld [vmem:[%s1821_s22 + $0x28] sm:$0xe]  ;;  %v1562_v63 = vcombine.low %v1546_v50, %v1965_v58  ;;  %v1107_v58 = vrot.slane %v1561_v56, 1 }
  0x3e   : > { %v1564_v14 = vcombine.low %v1548_v59, %v1987_v8  ;;  %v2076_v8 = vld [vmem:[%s1821_s22 + $0x38] sm:$0xf]  ;;  %v366_v39 = vrot.slane %v364_v20, 1  ;;  %v2090_v59 = vld [vmem:[%s1821_s22 + $0x40] sm:$0xf] }
  0x40   : > { %v1110_v29 = vrot.slane %v1564_v14, 1  ;;  %v367_v50 = vor.u32 %v366_v39, %v362_v37 }
  0x41   : > { %671 = vrot.lane.b32.xlu0 %v659_v16, %s1770_s23  ;;  %673 = vrot.lane.b32.xlu1 %v660_v19, %s1770_s23  ;;  %v1563_v16 = vcombine.low %v1547_v60, %v1980_v4  ;;  %v1108_v19 = vrot.slane %v1562_v63, 1  ;;  %v2079_v4 = vld [vmem:[%s1821_s22 + $0x3c] sm:$0x1]  ;;  %v1543_v60 = vld [vmem:[%s1821_s22 + $0x44] sm:$0x1] }
  0x42   : > { %v1457_v41 = vcombine.low %v2076_v8, %v2079_v4 }
  0x43   : > { %v1109_v30 = vrot.slane %v1563_v16, 1  ;;  %v1559_v16 = vcombine.low %v2090_v59, %v1543_v60 }
  0x44   : > { %v378_v56 = vshll.u32 %v1457_v41, 16  ;;  %v376_v17 = vshrl.u32 %v1457_v41, 16 }
  0x45   : > { %675 = vrot.lane.b32.xlu0 %v661_v28, %s1770_s23  ;;  %677 = vrot.lane.b32.xlu1 %v662_v35, %s1770_s23  ;;  %v2073_v28 = vld [vmem:[%s1821_s22 + $0x34] sm:$0x1]  ;;  %v1042_v35 = vshll.u32 %v1557_v18, 16  ;;  %v1056_v26 = vshll.u32 %v1559_v16, 16  ;;  %v1054_v39 = vshrl.u32 %v1559_v16, 16 }
  0x46   : > { %v1456_v36 = vcombine.low %v2070_v24, %v2073_v28 }
  0x47   : > { %v1044_v45 = vrot.slane %v1042_v35, 1 }
  0x48   : > { %v371_v46 = vshll.u32 %v1456_v36, 16  ;;  %v369_v0 = vshrl.u32 %v1456_v36, 16 }
  0x49   : > { %1067 = vrot.lane.b32.xlu0 %v1017_v40, %s1771_s24  ;;  %1069 = vrot.lane.b32.xlu1 %v1024_v38, %s1771_s24  ;;  %v1049_v40 = vshll.u32 %v1558_v23, 16  ;;  %v1040_v38 = vshrl.u32 %v1557_v18, 16  ;;  %v380_v18 = vrot.slane %v378_v56, 1  ;;  %v283_v23 = vld [vmem:[%s1821_s22 + $0x28] sm:$0xe] }
  0x4a   : > { %v373_v14 = vrot.slane %v371_v46, 1  ;;  %v1463_v35 = vcombine.low %v283_v23, %v2037_v52  ;;  %v285_v56 = vld [vmem:[%s1821_s22 + $0x38] sm:$0xe] }
  0x4b   : > { %v1045_v63 = vor.u32 %v1044_v45, %v1040_v38  ;;  %v381_v27 = vor.u32 %v380_v18, %v376_v17  ;;  %v1550_v38 = vld [vmem:[%s1821_s22 + $0x38] sm:$0xe]  ;;  %v1465_v16 = vcombine.low %v285_v56, %v2079_v4  ;;  %v1552_v17 = vld [vmem:[%s1821_s22 + $0x48] sm:$0xe] }
  0x4c   : > { %v427_v41 = vrot.slane %v1463_v35, 1 }
  0x4d   : > { %1071 = vrot.lane.b32.xlu0 %v1031_v53, %s1771_s24  ;;  %1073 = vrot.lane.b32.xlu1 %v1038_v62, %s1771_s24  ;;  %v1051_v53 = vrot.slane %v1049_v40, 1  ;;  %v1544_v62 = vld [vmem:[%s1821_s22 + $0x4c] sm:$0x1]  ;;  %v1058_v40 = vrot.slane %v1056_v26, 1 }
  0x4e   : > { %v1560_v20 = vcombine.low %v2094_v61, %v1544_v62 }
  0x4f   : > { %v1059_v52 = vor.u32 %v1058_v40, %v1054_v39 }
  0x50   : > { %v1063_v36 = vshll.u32 %v1560_v20, 16 }
  0x51   : > { %1115 = vrot.lane.b32.xlu0 %v1107_v58, %s1770_s23  ;;  %1117 = vrot.lane.b32.xlu1 %v1108_v19, %s1770_s23  ;;  %v1052_v58 = vor.u32 %v1051_v53, %v1047_v43  ;;  %v282_v19 = vld [vmem:[%s1821_s22 + $0x20] sm:$0xe]  ;;  %v1061_v43 = vshrl.u32 %v1560_v20, 16  ;;  %v284_v53 = vld [vmem:[%s1821_s22 + $0x30] sm:$0xe] }
  0x55   : > { %1119 = vrot.lane.b32.xlu0 %v1109_v30, %s1770_s23  ;;  %1121 = vrot.lane.b32.xlu1 %v1110_v29, %s1770_s23  ;;  %v374_v29 = vor.u32 %v373_v14, %v369_v0  ;;  %v1462_v30 = vcombine.low %v282_v19, %v2030_v49  ;;  %v1549_v49 = vld [vmem:[%s1821_s22 + $0x30] sm:$0xe]  ;;  %v1464_v0 = vcombine.low %v284_v53, %v2073_v28 }
  0x56   : > { %v1565_v45 = vcombine.low %v1549_v49, %v2053_v5  ;;  %v1568_v19 = vcombine.low %v1552_v17, %v1544_v62 }
  0x57   : > { %v426_v37 = vrot.slane %v1462_v30, 1  ;;  %v428_v5 = vrot.slane %v1464_v0, 1  ;;  %v1745_v0 = vld [vmem:[%s2271_s1 + $0x20] ss:$0 sps:$4 sm:$0xff]  }
  0x58   : > { %v1114_v28 = vrot.slane %v1568_v19, 1 }
  0x59   : > { %390 = vrot.lane.b32.xlu0 %v360_v44, %s1771_s24  ;;  %392 = vrot.lane.b32.xlu1 %v367_v50, %s1771_s24  ;;  %v1065_v44 = vrot.slane %v1063_v36, 1  ;;  %v1566_v50 = vcombine.low %v1550_v38, %v2059_v11  ;;  %v429_v11 = vrot.slane %v1465_v16, 1 }
  0x5b   : > { %v1066_v46 = vor.u32 %v1065_v44, %v1061_v43  ;;  %v1112_v14 = vrot.slane %v1566_v50, 1 }
  0x5d   : > { %1075 = vrot.lane.b32.xlu0 %v1045_v63, %s1771_s24  ;;  %1077 = vrot.lane.b32.xlu1 %v1052_v58, %s1771_s24  ;;  %v1111_v63 = vrot.slane %v1565_v45, 1  ;;  %v1551_v58 = vld [vmem:[%s1821_s22 + $0x40] sm:$0xe]  ;;  %s2237_s22 = scalar_lea.vmem %s2274_s4, %s1585_s11 }
  0x5e   : > { %v1567_v18 = vcombine.low %v1551_v58, %v1543_v60 }
  0x60   : > { %v1113_v20 = vrot.slane %v1567_v18, 1  ;;  %v1217_v18 = vsel %vm765_vm0, %v1745_v0, 0 }
  0x61   : > { %394 = vrot.lane.b32.xlu0 %v374_v29, %s1771_s24  ;;  %396 = vrot.lane.b32.xlu1 %v381_v27, %s1771_s24 }
  0x65   : > { %438 = vrot.lane.b32.xlu0 %v426_v37, %s1770_s23  ;;  %440 = vrot.lane.b32.xlu1 %v427_v41, %s1770_s23 }
  0x69   : > { %1079 = vrot.lane.b32.xlu0 %v1059_v52, %s1771_s24  ;;  %1081 = vrot.lane.b32.xlu1 %v1066_v46, %s1771_s24 }
  0x6d   : > { %1123 = vrot.lane.b32.xlu0 %v1111_v63, %s1770_s23  ;;  %1125 = vrot.lane.b32.xlu1 %v1112_v14, %s1770_s23 }
  0x71   : > { %442 = vrot.lane.b32.xlu0 %v428_v5, %s1770_s23  ;;  %444 = vrot.lane.b32.xlu1 %v429_v11, %s1770_s23 }
  0x75   : > { %1127 = vrot.lane.b32.xlu0 %v1113_v20, %s1770_s23  ;;  %1129 = vrot.lane.b32.xlu1 %v1114_v28, %s1770_s23 }
  0x89   : > { %v433_v4 = vpop.permute.xlu1 %432 }
  0x8a   : > { %v431_v23 = vpop.permute.xlu0 %430 }
  0x8f   : > { %v383_v29 = vpop.permute.xlu0 %382  ;;  %v616_v30 = vpop.permute.xlu1 %615 }
  0x90   : > { %v449_v60 = vsel %vm446_vm1, %v1832_v7, %v383_v29  ;;  %v681_v7 = vsel %vm446_vm1, %v1836_v10, %v616_v30 }
  0x91   : > { %v473_v35 = vsel %vm471_vm2, %v449_v60, %v431_v23 }
  0x93   : > { %v385_v62 = vpop.permute.xlu0 %384  ;;  %v618_v26 = vpop.permute.xlu1 %617 }
  0x94   : > { %v452_v27 = vsel %vm446_vm1, %v1826_v2, %v385_v62  ;;  %v684_v49 = vsel %vm446_vm1, %v1842_v12, %v618_v26 }
  0x95   : > { %v475_v36 = vsel %vm471_vm2, %v452_v27, %v433_v4 }
  0x96   : > { %v1519_v37 = vcombine.low %v473_v35, %v475_v36 }
  0x97   : > { %v387_v39 = vpop.permute.xlu0 %386  ;;  %v389_v40 = vpop.permute.xlu1 %388 }
  0x98   : > { %1621 = vmatprep.mubr.msk.bf16.mxu0 %vm752_vm3, %v1519_v37  ;;  %v455_v46 = vsel %vm446_vm1, %v1862_v31, %v387_v39  ;;  %v458_v53 = vsel %vm446_vm1, %v1852_v21, %v389_v40 }
  0x9b   : > { %v620_v41 = vpop.permute.xlu0 %619  ;;  %v622_v43 = vpop.permute.xlu1 %621 }
  0x9c   : > { %v687_v14 = vsel %vm446_vm1, %v1878_v42, %v620_v41  ;;  %v690_v16 = vsel %vm446_vm1, %v1868_v34, %v622_v43 }
  0x9f   : > { %v664_v44 = vpop.permute.xlu0 %663  ;;  %v666_v2 = vpop.permute.xlu1 %665 }
  0xa0   : > { %v704_v38 = vsel %vm471_vm2, %v681_v7, %v664_v44  ;;  %v706_v52 = vsel %vm471_vm2, %v684_v49, %v666_v2 }
  0xa1   : > { %v1509_v45 = vcombine.low %v704_v38, %v706_v52 }
  0xa3   : > { %v435_v50 = vpop.permute.xlu0 %434  ;;  %v437_v56 = vpop.permute.xlu1 %436  ;;  %1609 = vmatprep.mubr.msk.bf16.mxu1 %vm752_vm3, %v1509_v45 }
  0xa4   : > { %v477_v10 = vsel %vm471_vm2, %v455_v46, %v435_v50  ;;  %v479_v12 = vsel %vm471_vm2, %v458_v53, %v437_v56 }
  0xa5   : > { %v1520_v63 = vcombine.low %v477_v10, %v479_v12 }
  0xa7   : > { %v668_v31 = vpop.permute.xlu0 %667  ;;  %v670_v21 = vpop.permute.xlu1 %669  ;;  %1622 = vmatmul.mubr.msk.bf16.vlgmr.msra.gmra.mrb[0].mxu0 %vm752_vm3, %v1520_v63 }
  0xa8   : > { %v708_v58 = vsel %vm471_vm2, %v687_v14, %v668_v31  ;;  %v710_v17 = vsel %vm471_vm2, %v690_v16, %v670_v21  ;;  %1630 = vmatpush3.bf16.msra.mxu0 %v2017_v33 }
  0xa9   : > { %v1510_v5 = vcombine.low %v708_v58, %v710_v17  ;;  %1664 = vmatprep.subr.msk.bf16.mxu0 %vm765_vm0, %v1745_v0 }
  0xab   : > { %v624_v11 = vpop.permute.xlu0 %623  ;;  %v626_v42 = vpop.permute.xlu1 %625  ;;  %1610 = vmatmul.mubr.msk.bf16.vlgmr.msra.gmra.mrb[0].mxu1 %vm752_vm3, %v1510_v5 }
  0xac   : > { %1632 = vmatpush3.bf16.msra.mxu0 %v1217_v18  ;;  %1643 = vmatpush3.bf16.msra.mxu1 %v1889_v48  ;;  %v693_v33 = vsel %vm446_vm1, %v1907_v6, %v624_v11  ;;  %v696_v28 = vsel %vm446_vm1, %v1914_v13, %v626_v42 }
  0xad   : > { %1663 = vmatprep.subr.msk.bf16.mxu1 %vm765_vm0, %v1993_v15 }
  0xaf   : > { %v628_v34 = vpop.permute.xlu0 %627  ;;  %v630_v19 = vpop.permute.xlu1 %629 }
  0xb0   : > { %1644 = vmatpush3.bf16.msra.mxu1 %v2011_v32  ;;  %v699_v15 = vsel %vm446_vm1, %v1929_v22, %v628_v34  ;;  %v702_v32 = vsel %vm446_vm1, %v1936_v25, %v630_v19 }
  0xb3   : > { %v672_v20 = vpop.permute.xlu0 %671  ;;  %v674_v4 = vpop.permute.xlu1 %673 }
  0xb4   : > { %v712_v23 = vsel %vm471_vm2, %v693_v33, %v672_v20  ;;  %v714_v29 = vsel %vm471_vm2, %v696_v28, %v674_v4 }
  0xb5   : > { %v1511_v48 = vcombine.low %v712_v23, %v714_v29 }
  0xb7   : > { %v676_v30 = vpop.permute.xlu0 %675  ;;  %v678_v60 = vpop.permute.xlu1 %677  ;;  %1613 = vmatprep.mubr.msk.bf16.mxu1 %vm752_vm3, %v1511_v48 }
  0xb8   : > { %v716_v6 = vsel %vm471_vm2, %v699_v15, %v676_v30  ;;  %v718_v13 = vsel %vm471_vm2, %v702_v32, %v678_v60 }
  0xb9   : > { %v1512_v62 = vcombine.low %v716_v6, %v718_v13  ;;  %v1309_v13 = vld [vmem:[%s2227_s14 + $0x10] sm:$0xff] }
  0xbb   : > { %v1068_v26 = vpop.permute.xlu0 %1067  ;;  %v1070_v27 = vpop.permute.xlu1 %1069  ;;  %1614 = vmatmul.mubr.msk.bf16.gmra.mrb[4].mxu1 %vm752_vm3, %v1512_v62 }
  0xbc   : > { %v1133_v22 = vsel %vm446_vm1, %v1955_v54, %v1068_v26  ;;  %v1136_v25 = vsel %vm446_vm1, %v1962_v57, %v1070_v27 }
  0xbf   : > { %v1072_v35 = vpop.permute.xlu0 %1071  ;;  %v1074_v36 = vpop.permute.xlu1 %1073 }
  0xc0   : > { %v1139_v7 = vsel %vm446_vm1, %v1977_v3, %v1072_v35  ;;  %v1142_v49 = vsel %vm446_vm1, %v1984_v9, %v1074_v36  ;;  %v1307_v35 = vld [vmem:[%s2227_s14] sm:$0xff] }
  0xc3   : > { %v1116_v37 = vpop.permute.xlu0 %1115  ;;  %v1118_v39 = vpop.permute.xlu1 %1117 }
  0xc4   : > { %v1156_v40 = vsel %vm471_vm2, %v1133_v22, %v1116_v37  ;;  %v1158_v41 = vsel %vm471_vm2, %v1136_v25, %v1118_v39  ;;  %v1310_v25 = vld [vmem:[%s2227_s14 + $0x18] sm:$0xff] }
  0xc5   : > { %v1572_v43 = vcombine.low %v1156_v40, %v1158_v41 }
  0xc7   : > { %v1120_v44 = vpop.permute.xlu0 %1119  ;;  %v1122_v2 = vpop.permute.xlu1 %1121  ;;  %1633 = vmatprep.mubr.msk.bf16.mxu0 %vm752_vm3, %v1572_v43  ;;  %v1308_v43 = vld [vmem:[%s2227_s14 + $0x8] sm:$0xff] }
  0xc8   : > { %v1160_v54 = vsel %vm471_vm2, %v1139_v7, %v1120_v44  ;;  %v1162_v57 = vsel %vm471_vm2, %v1142_v49, %v1122_v2 }
  0xc9   : > { %v1573_v38 = vcombine.low %v1160_v54, %v1162_v57 }
  0xcb   : > { %v391_v52 = vpop.permute.xlu0 %390  ;;  %v393_v45 = vpop.permute.xlu1 %392  ;;  %1634 = vmatmul.mubr.msk.bf16.vlgmr.msra.gmra.mrb[0].mxu0 %vm752_vm3, %v1573_v38 }
  0xcc   : > { %v461_v56 = vsel %vm446_vm1, %v2027_v47, %v391_v52  ;;  %v464_v10 = vsel %vm446_vm1, %v2034_v51, %v393_v45 }
  0xcf   : > { %v1076_v46 = vpop.permute.xlu0 %1075  ;;  %v1078_v50 = vpop.permute.xlu1 %1077 }
  0xd0   : > { %v1145_v21 = vsel %vm446_vm1, %v2050_v1, %v1076_v46  ;;  %v1148_v47 = vsel %vm446_vm1, %v2056_v55, %v1078_v50 }
  0xd3   : > { %v395_v53 = vpop.permute.xlu0 %394  ;;  %v397_v3 = vpop.permute.xlu1 %396 }
  0xd4   : > { %v467_v11 = vsel %vm446_vm1, %v2070_v24, %v395_v53  ;;  %v470_v34 = vsel %vm446_vm1, %v2076_v8, %v397_v3  ;;  %v1313_v53 = vld [vmem:[%s2227_s14 + $0x30] sm:$0xff] }
  0xd7   : > { %v439_v9 = vpop.permute.xlu0 %438  ;;  %v441_v12 = vpop.permute.xlu1 %440 }
  0xd8   : > { %v481_v63 = vsel %vm471_vm2, %v461_v56, %v439_v9  ;;  %v483_v0 = vsel %vm471_vm2, %v464_v10, %v441_v12  ;;  %v1311_v10 = vld [vmem:[%s2227_s14 + $0x20] sm:$0xff] }
  0xd9   : > { %v1521_v14 = vcombine.low %v481_v63, %v483_v0 }
  0xdb   : > { %v1080_v31 = vpop.permute.xlu0 %1079  ;;  %v1082_v16 = vpop.permute.xlu1 %1081  ;;  %1625 = vmatprep.mubr.msk.bf16.mxu1 %vm752_vm3, %v1521_v14  ;;  %v1314_v14 = vld [vmem:[%s2227_s14 + $0x38] sm:$0xff] }
  0xdc   : > { %v1151_v20 = vsel %vm446_vm1, %v2090_v59, %v1080_v31  ;;  %v1154_v24 = vsel %vm446_vm1, %v2094_v61, %v1082_v16  ;;  %v1582_v61 = vld [vmem:[%s2272_s2] ss:$0 sm:$0xff] }
  0xdf   : > { %v1124_v58 = vpop.permute.xlu0 %1123  ;;  %v1126_v17 = vpop.permute.xlu1 %1125 }
  0xe0   : > { %v1164_v51 = vsel %vm471_vm2, %v1145_v21, %v1124_v58  ;;  %v1166_v5 = vsel %vm471_vm2, %v1148_v47, %v1126_v17  ;;  %v1312_v58 = vld [vmem:[%s2227_s14 + $0x28] sm:$0xff] }
  0xe1   : > { %v1574_v18 = vcombine.low %v1164_v51, %v1166_v5 }
  0xe3   : > { %v443_v42 = vpop.permute.xlu0 %442  ;;  %v445_v19 = vpop.permute.xlu1 %444  ;;  %1637 = vmatprep.mubr.msk.bf16.mxu0 %vm752_vm3, %v1574_v18 }
  0xe4   : > { %v485_v1 = vsel %vm471_vm2, %v467_v11, %v443_v42  ;;  %v487_v55 = vsel %vm471_vm2, %v470_v34, %v445_v19 }
  0xe5   : > { %v1522_v33 = vcombine.low %v485_v1, %v487_v55 }
  0xe7   : > { %v1128_v28 = vpop.permute.xlu0 %1127  ;;  %v1130_v4 = vpop.permute.xlu1 %1129  ;;  %1626 = vmatmul.mubr.msk.bf16.vlgmr.msra.gmra.mrb[4].mxu1 %vm752_vm3, %v1522_v33 }
  0xe8   : > { %v1168_v8 = vsel %vm471_vm2, %v1151_v20, %v1128_v28  ;;  %v1170_v23 = vsel %vm471_vm2, %v1154_v24, %v1130_v4 }
  0xe9   : > { %v1575_v29 = vcombine.low %v1168_v8, %v1170_v23 }
  0xeb   : > { %1638 = vmatmul.mubr.msk.bf16.gmra.mrb[4].mxu0 %vm752_vm3, %v1575_v29 }
 0x17e   : > { %v1611_v48 = vpop.f32.mrb[0].mxu1 }
 0x17f   : > { %v803_v15 = vpop.f32.mrb[1].mxu1 }
 0x180   : > { %v1612_v30 = vpop.f32.mrb[2].mxu1 }
 0x181   : > { %v806_v32 = vpop.f32.mrb[3].mxu1 }
 0x19e   : > { %v1635_v59 = vpop.f32.mrb[0].mxu0 }
 0x19f   : > { %v1645_v60 = vadd.f32 %v1635_v59, %v1611_v48  ;;  %v1253_v6 = vpop.f32.mrb[1].mxu0 }
 0x1a0   : > { %v1646_v62 = vadd.f32 %v1253_v6, %v803_v15  ;;  %v1636_v26 = vpop.f32.mrb[2].mxu0 }
 0x1a1   : > { %v1301_v27 = vadd.f32 %v1645_v60, %v1582_v61  ;;  %v1647_v36 = vadd.f32 %v1636_v26, %v1612_v30  ;;  %v1256_v22 = vpop.f32.mrb[3].mxu0 }
 0x1a2   : > { %v1299_v37 = vadd.f32 %v1646_v62, %v1582_v61  ;;  %v1648_v39 = vadd.f32 %v1256_v22, %v806_v32 }
 0x1a3   : > { %v1317_v40 = vadd.f32 %v1309_v13, %v1301_v27  ;;  %v1302_v41 = vadd.f32 %v1647_v36, %v1582_v61 }
 0x1a4   : > { %v1315_v7 = vadd.f32 %v1307_v35, %v1299_v37  ;;  %v1300_v44 = vadd.f32 %v1648_v39, %v1582_v61 }
 0x1a5   : > { %1325 = vst.msk [vmem:[%s2237_s22 + $0x10] sm:$0xff] %vm446_vm1, %v1317_v40  ;;  %v1318_v49 = vadd.f32 %v1310_v25, %v1302_v41 }
 0x1a6   : > { %1323 = vst.msk [vmem:[%s2237_s22] sm:$0xff] %vm446_vm1, %v1315_v7  ;;  %v1316_v2 = vadd.f32 %v1308_v43, %v1300_v44 }
 0x1a7   : > { %1326 = vst.msk [vmem:[%s2237_s22 + $0x18] sm:$0xff] %vm446_vm1, %v1318_v49 }
 0x1a8   : > { %1324 = vst.msk [vmem:[%s2237_s22 + $0x8] sm:$0xff] %vm446_vm1, %v1316_v2 }
 0x1ba   : > { %v1627_v54 = vpop.f32.mrb[4].mxu1 }
 0x1bb   : > { %v928_v57 = vpop.f32.mrb[5].mxu1 }
 0x1bc   : > { %v1628_v38 = vpop.f32.mrb[6].mxu1 }
 0x1bd   : > { %v931_v52 = vpop.f32.mrb[7].mxu1 }
 0x1be   : > { %v1639_v45 = vpop.f32.mrb[4].mxu0 }
 0x1bf   : > { %v1649_v46 = vadd.f32 %v1639_v45, %v1627_v54  ;;  %v1269_v50 = vpop.f32.mrb[5].mxu0 }
 0x1c0   : > { %v1650_v3 = vadd.f32 %v1269_v50, %v928_v57  ;;  %v1640_v56 = vpop.f32.mrb[6].mxu0 }
 0x1c1   : > { %v1305_v9 = vadd.f32 %v1649_v46, %v1582_v61  ;;  %v1651_v12 = vadd.f32 %v1640_v56, %v1628_v38  ;;  %v1272_v63 = vpop.f32.mrb[7].mxu0 }
 0x1c2   : > { %v1303_v0 = vadd.f32 %v1650_v3, %v1582_v61  ;;  %v1652_v31 = vadd.f32 %v1272_v63, %v931_v52 }
 0x1c3   : > { %v1321_v16 = vadd.f32 %v1313_v53, %v1305_v9  ;;  %v1306_v21 = vadd.f32 %v1651_v12, %v1582_v61 }
 0x1c4   : > { %v1319_v47 = vadd.f32 %v1311_v10, %v1303_v0  ;;  %v1304_v17 = vadd.f32 %v1652_v31, %v1582_v61 }
 0x1c5   : > { %1329 = vst.msk [vmem:[%s2237_s22 + $0x30] sm:$0xff] %vm446_vm1, %v1321_v16  ;;  %v1322_v51 = vadd.f32 %v1314_v14, %v1306_v21 }
 0x1c6   : > { %1327 = vst.msk [vmem:[%s2237_s22 + $0x20] sm:$0xff] %vm446_vm1, %v1319_v47  ;;  %v1320_v5 = vadd.f32 %v1312_v58, %v1304_v17 }
 0x1c7   : > { %1330 = vst.msk [vmem:[%s2237_s22 + $0x38] sm:$0xff] %vm446_vm1, %v1322_v51 }
 0x1c8   : > { %1328 = vst.msk [vmem:[%s2237_s22 + $0x28] sm:$0xff] %vm446_vm1, %v1320_v5 }
 0x1c9 PF: > { %s14_s17 = sadd.s32 1, %s1768_s17   ;;  %s2275_s15 = smov %s1764_s16 }
 0x1ca   : > { %p11_p5 = scmp.ge.s32.totalorder %s14_s17, 4   ;;  %s2276_s16 = smov %s2278_s18 }
 0x1cc   :  { %13 = sbr.rel (!%p11_p5) target bundleno = 2 (0x2), region = 74 }

// kernel: block_forward.4
= control target key start
LH: loop header
LB: loop body
LE: loop exit
PB: predicated region body
PF: predicated region fallthrough
CT: control target
= control target key end

     0   :  { %s1669_s12 = smov 0   ;;  %s1671_s13 = smov 0   ;;  %s2029_s0 = inlined_call_operand.vmem [shape: bf16[8,9,9,4], index: 0, kind: input, shape index: {}]   ;;  %s2030_s1 = inlined_call_operand.vmem [shape: bf16[3,12,8], index: 1, kind: input, shape index: {}]   ;;  %s2031_s2 = inlined_call_operand.vmem [shape: f32[1,8], index: 2, kind: input, shape index: {}]   ;;  %s2032_s3 = inlined_call_operand.vmem [shape: f32[2,64,8], index: 3, kind: output, shape index: {}]  }
   0x1   :  { %s1673_s14 = smov 0  }
   0x2 LB: > { %s25_s15 = sadd.s32 1, %s1641_s13  ;;  %p1334_p0 = scmp.ge.s32.totalorder %s1645_s14, 1  ;;  %s1645_s14 = sphi %s1673_s14, %s13_s14   ;;  %s1641_s13 = sphi %s1671_s13, %s2034_s13   ;;  %s1637_s12 = sphi %s1669_s12, %s2033_s12  }
   0x3   : > { %p27_p1 = scmp.ge.s32.totalorder %s25_s15, 2  ;;  %p153_p2 = scmp.lt.s32.totalorder %s1645_s14, 3 }
   0x5   : > { %s2036_s15 = smov (%p27_p1, %s25_s15), 0  ;;  %p154_p3 = pnand %p1334_p0, %p153_p2 }
   0x6   : > { %s1335_s16 = sshll.u32 (!%p154_p3), %s1637_s12, 2  ;;  %s1647_s21 = smov (!%p154_p3), 4   ;;  %vm690_vm0 = vcmask (!%p154_p3), 1045504   ;;  %vm383_vm1 = vcmask (!%p154_p3), 31744   ;;  %vm408_vm2 = vcmask (!%p154_p3), 64512   ;;  %vm677_vm3 = vcmask (!%p154_p3), 97280  }
   0x7   : > { %157 = sbr.rel (%p154_p3) target bundleno = 449 (0x1c1), region = 32  ;;  %p183_p4 = scmp.lt.s32.totalorder (!%p154_p3), %s1335_s16, 7 }
   0x8   : > { %s1648_s22 = smov (!%p154_p3), 8   ;;  %p190_p5 = scmp.lt.s32.totalorder (!%p154_p3), %s1637_s12, 1 }
   0xe   : > { %s2038_s16 = smov (!%p183_p4, %s1335_s16), 7  ;;  %s2040_s12 = smov (!%p190_p5, %s1637_s12), 1 }
   0xf   : > { %s1545_s17 = smul.u32 72, %s2038_s16  ;;  %s1477_s29 = sshll.u32 %s2040_s12, 6 }
  0x10   : > { %s2002_s7 = scalar_lea.vmem %s2032_s3, %s1477_s29 }
  0x11   : > { %s1693_s20 = scalar_lea.vmem %s2029_s0, %s1545_s17 }
  0x12   : > { %v1572_v0 = vld [vmem:[%s1693_s20 + $0xd8] ss:$0 sps:$4 sm:$0xff]   ;;  %v1573_v1 = vld [vmem:[%s1693_s20 + $0x48] ss:$0 sps:$4 sm:$0xff]   ;;  %v1574_v2 = vld [vmem:[%s1693_s20 + $0xe0] ss:$0 sps:$4 sm:$0xff]  }
  0x13   : > { %481 = vrot.lane.b32.xlu1 %v1572_v0, %s1647_s21  ;;  %255 = vrot.lane.b32.xlu0 %v1573_v1, %s1647_s21  ;;  %v1575_v3 = vld [vmem:[%s1693_s20 + $0x50] ss:$0 sps:$4 sm:$0xff]   ;;  %v1576_v4 = vld [vmem:[%s1693_s20 + $0x60] ss:$0 sps:$4 sm:$0xff]  }
  0x14   : > { %v1577_v5 = vld [vmem:[%s1693_s20 + $0x58] ss:$0 sps:$4 sm:$0xff]   ;;  %v1704_v6 = vld [vmem:[%s1693_s20 + $0x8] sm:$0xf]  ;;  %v224_v7 = vld [vmem:[%s1693_s20 + $0xc] sm:$0x1] }
  0x15   : > { %v1356_v8 = vcombine.low %v1704_v6, %v224_v7  ;;  %v1710_v9 = vld [vmem:[%s1693_s20] sm:$0xf]  ;;  %v223_v10 = vld [vmem:[%s1693_s20 + $0x4] sm:$0x1]  ;;  %v1714_v11 = vld [vmem:[%s1693_s20 + $0x98] sm:$0xf] }
  0x16   : > { %v1355_v12 = vcombine.low %v1710_v9, %v223_v10  ;;  %v1380_v13 = vld [vmem:[%s1693_s20 + $0x9c] sm:$0x1]  ;;  %v1720_v14 = vld [vmem:[%s1693_s20 + $0x90] sm:$0xf]  ;;  %v1379_v15 = vld [vmem:[%s1693_s20 + $0x94] sm:$0x1] }
  0x17   : > { %483 = vrot.lane.b32.xlu1 %v1574_v2, %s1647_s21  ;;  %257 = vrot.lane.b32.xlu0 %v1575_v3, %s1647_s21  ;;  %v1578_v16 = vld [vmem:[%s1693_s20 + $0xf0] ss:$0 sps:$4 sm:$0xff]   ;;  %v321_v17 = vshll.u32 %v1356_v8, 16  ;;  %v1396_v18 = vcombine.low %v1714_v11, %v1380_v13  ;;  %v1395_v19 = vcombine.low %v1720_v14, %v1379_v15  ;;  %v1727_v20 = vld [vmem:[%s1693_s20 + $0x18] sm:$0xf]  ;;  %v319_v22 = vshrl.u32 %v1356_v8, 16 }
  0x18   : > { %v226_v21 = vld [vmem:[%s1693_s20 + $0x1c] sm:$0x1]  ;;  %v314_v23 = vshll.u32 %v1355_v12, 16  ;;  %v1731_v24 = vld [vmem:[%s1693_s20 + $0x10] sm:$0xf]  ;;  %v312_v28 = vshrl.u32 %v1355_v12, 16 }
  0x19   : > { %v225_v25 = vld [vmem:[%s1693_s20 + $0x14] sm:$0x1]  ;;  %v1579_v26 = vld [vmem:[%s1693_s20 + $0xe8] ss:$0 sps:$4 sm:$0xff]   ;;  %v323_v27 = vrot.slane %v321_v17, 1  ;;  %v547_v29 = vshll.u32 %v1396_v18, 16  ;;  %v1358_v30 = vcombine.low %v1727_v20, %v226_v21 }
  0x1a   : > { %v316_v31 = vrot.slane %v314_v23, 1  ;;  %v540_v32 = vshll.u32 %v1395_v19, 16  ;;  %v1739_v33 = vld [vmem:[%s1693_s20 + $0xa8] sm:$0xf]  ;;  %v1382_v34 = vld [vmem:[%s1693_s20 + $0xac] sm:$0x1]  ;;  %v1357_v35 = vcombine.low %v1731_v24, %v225_v25 }
  0x1b   : > { %261 = vrot.lane.b32.xlu1 %v1576_v4, %s1647_s21  ;;  %259 = vrot.lane.b32.xlu0 %v1577_v5, %s1647_s21  ;;  %v1744_v36 = vld [vmem:[%s1693_s20 + $0xa0] sm:$0xf]  ;;  %v1381_v37 = vld [vmem:[%s1693_s20 + $0xa4] sm:$0x1]  ;;  %v545_v38 = vshrl.u32 %v1396_v18, 16  ;;  %v538_v39 = vshrl.u32 %v1395_v19, 16  ;;  %v324_v40 = vor.u32 %v323_v27, %v319_v22  ;;  %v1398_v43 = vcombine.low %v1739_v33, %v1382_v34 }
  0x1c   : > { %v549_v41 = vrot.slane %v547_v29, 1  ;;  %v335_v42 = vshll.u32 %v1358_v30, 16  ;;  %v317_v44 = vor.u32 %v316_v31, %v312_v28  ;;  %v542_v45 = vrot.slane %v540_v32, 1  ;;  %v1755_v59 = vld [vmem:[%s1693_s20 + $0xb8] sm:$0xf] }
  0x1d   : > { %v328_v46 = vshll.u32 %v1357_v35, 16  ;;  %v1397_v47 = vcombine.low %v1744_v36, %v1381_v37  ;;  %v333_v49 = vshrl.u32 %v1358_v30, 16  ;;  %v561_v51 = vshll.u32 %v1398_v43, 16  ;;  %v1384_v63 = vld [vmem:[%s1693_s20 + $0xbc] sm:$0x1] }
  0x1e   : > { %v550_v48 = vor.u32 %v549_v41, %v545_v38  ;;  %v337_v50 = vrot.slane %v335_v42, 1  ;;  %v543_v52 = vor.u32 %v542_v45, %v538_v39  ;;  %v326_v53 = vshrl.u32 %v1357_v35, 16  ;;  %v1760_v0 = vld [vmem:[%s1693_s20 + $0xb0] sm:$0xf]  ;;  %v1383_v1 = vld [vmem:[%s1693_s20 + $0xb4] sm:$0x1] }
  0x1f   : > { %487 = vrot.lane.b32.xlu1 %v1578_v16, %s1647_s21  ;;  %485 = vrot.lane.b32.xlu0 %v1579_v26, %s1647_s21  ;;  %v330_v54 = vrot.slane %v328_v46, 1  ;;  %v554_v55 = vshll.u32 %v1397_v47, 16  ;;  %v559_v57 = vshrl.u32 %v1398_v43, 16  ;;  %v563_v58 = vrot.slane %v561_v51, 1  ;;  %v1768_v7 = vld [vmem:[%s1693_s20 + $0xc8] sm:$0xf] }
  0x20   : > { %v338_v56 = vor.u32 %v337_v50, %v333_v49  ;;  %v552_v61 = vshrl.u32 %v1397_v47, 16  ;;  %v1400_v3 = vcombine.low %v1755_v59, %v1384_v63  ;;  %v1399_v5 = vcombine.low %v1760_v0, %v1383_v1  ;;  %v1386_v8 = vld [vmem:[%s1693_s20 + $0xcc] sm:$0x1]  ;;  %v1772_v10 = vld [vmem:[%s1693_s20 + $0xc0] sm:$0xf] }
  0x21   : > { %v331_v60 = vor.u32 %v330_v54, %v326_v53  ;;  %v556_v62 = vrot.slane %v554_v55, 1  ;;  %v564_v2 = vor.u32 %v563_v58, %v559_v57  ;;  %v1385_v12 = vld [vmem:[%s1693_s20 + $0xc4] sm:$0x1]  ;;  %v1588_v13 = vld [vmem:[%s1693_s20 + $0x100] ss:$0 sps:$4 sm:$0xff]   ;;  %v1402_v16 = vcombine.low %v1768_v7, %v1386_v8 }
  0x22   : > { %v575_v15 = vshll.u32 %v1400_v3, 16  ;;  %v1589_v17 = vld [vmem:[%s1693_s20 + $0xf8] ss:$0 sps:$4 sm:$0xff]   ;;  %v568_v18 = vshll.u32 %v1399_v5, 16  ;;  %v1401_v19 = vcombine.low %v1772_v10, %v1385_v12  ;;  %v1590_v21 = vld [vmem:[%s1693_s20 + $0x110] ss:$0 sps:$4 sm:$0xff]  }
  0x23   : > { %369 = vrot.lane.b32.xlu1 %v324_v40, %s1648_s22  ;;  %367 = vrot.lane.b32.xlu0 %v317_v44, %s1648_s22  ;;  %v557_v4 = vor.u32 %v556_v62, %v552_v61  ;;  %v573_v22 = vshrl.u32 %v1400_v3, 16  ;;  %v589_v25 = vshll.u32 %v1402_v16, 16  ;;  %v1591_v26 = vld [vmem:[%s1693_s20 + $0x108] ss:$0 sps:$4 sm:$0xff]   ;;  %v566_v27 = vshrl.u32 %v1399_v5, 16 }
  0x24   : > { %v577_v23 = vrot.slane %v575_v15, 1  ;;  %v570_v28 = vrot.slane %v568_v18, 1  ;;  %v582_v29 = vshll.u32 %v1401_v19, 16  ;;  %v587_v31 = vshrl.u32 %v1402_v16, 16  ;;  %v1788_v38 = vld [vmem:[%s1693_s20 + $0x10] sm:$0xf] }
  0x25   : > { %v591_v32 = vrot.slane %v589_v25, 1  ;;  %v580_v35 = vshrl.u32 %v1401_v19, 16  ;;  %v1440_v39 = vld [vmem:[%s1693_s20 + $0x14] sm:$0x1]  ;;  %v1792_v40 = vld [vmem:[%s1693_s20 + $0x8] sm:$0xf] }
  0x26   : > { %v578_v30 = vor.u32 %v577_v23, %v573_v22  ;;  %v571_v34 = vor.u32 %v570_v28, %v566_v27  ;;  %v584_v37 = vrot.slane %v582_v29, 1  ;;  %v1439_v41 = vld [vmem:[%s1693_s20 + $0xc] sm:$0x1]  ;;  %v1456_v43 = vcombine.low %v1788_v38, %v1440_v39  ;;  %v1800_v46 = vld [vmem:[%s1693_s20 + $0x20] sm:$0xf] }
  0x27   : > { %595 = vrot.lane.b32.xlu1 %v550_v48, %s1648_s22  ;;  %593 = vrot.lane.b32.xlu0 %v543_v52, %s1648_s22  ;;  %v592_v42 = vor.u32 %v591_v32, %v587_v31  ;;  %v1455_v45 = vcombine.low %v1792_v40, %v1439_v41  ;;  %v1442_v47 = vld [vmem:[%s1693_s20 + $0x24] sm:$0x1]  ;;  %v1807_v49 = vld [vmem:[%s1693_s20 + $0x18] sm:$0xf] }
  0x28   : > { %v585_v44 = vor.u32 %v584_v37, %v580_v35  ;;  %v1620_v48 = vld [vmem:[%s2030_s1] sm:$0x3f]   ;;  %v1441_v50 = vld [vmem:[%s1693_s20 + $0x1c] sm:$0x1]  ;;  %v1621_v51 = vld [vmem:[%s2030_s1 + $0x8] sm:$0x3f]   ;;  %v1458_v55 = vcombine.low %v1800_v46, %v1442_v47 }
  0x29   : > { %1542 = vmatprep.subr.msk.bf16.mxu0 %vm690_vm0, %v1620_v48  ;;  %v1815_v52 = vsel %vm690_vm0, %v1620_v48, 0  ;;  %v1596_v53 = vld [vmem:[%s1693_s20 + $0x58] ss:$0 sps:$4 sm:$0xff]   ;;  %v985_v54 = vshll.u32 %v1456_v43, 16  ;;  %v978_v57 = vshll.u32 %v1455_v45, 16  ;;  %v1457_v58 = vcombine.low %v1807_v49, %v1441_v50  ;;  %1541 = vmatprep.subr.msk.bf16.mxu1 %vm690_vm0, %v1621_v51 }
  0x2a   : > { %1504 = vmatpush3.bf16.msra.mxu0 %v1815_v52  ;;  %v1622_v61 = vld [vmem:[%s2030_s1 + $0x10] sm:$0x3f]   ;;  %v1598_v63 = vld [vmem:[%s1693_s20 + $0x68] ss:$0 sps:$4 sm:$0xff]   ;;  %v983_v1 = vshrl.u32 %v1456_v43, 16  ;;  %v999_v3 = vshll.u32 %v1458_v55, 16 }
  0x2b   : > { %373 = vrot.lane.b32.xlu1 %v338_v56, %s1648_s22  ;;  %371 = vrot.lane.b32.xlu0 %v331_v60, %s1648_s22  ;;  %v1597_v56 = vld [vmem:[%s1693_s20 + $0x50] ss:$0 sps:$4 sm:$0xff]   ;;  %v692_v60 = vsel %vm690_vm0, %v1621_v51, 0  ;;  %v1831_v62 = vsel %vm690_vm0, %v1622_v61, 0  ;;  %v976_v5 = vshrl.u32 %v1455_v45, 16  ;;  %v980_v8 = vrot.slane %v978_v57, 1 }
  0x2c   : > { %1494 = vmatpush3.bf16.msra.mxu1 %v692_v60  ;;  %1544 = vmatprep.subr.msk.bf16.mxu0 %vm690_vm0, %v1622_v61  ;;  %v992_v12 = vshll.u32 %v1457_v58, 16  ;;  %v997_v15 = vshrl.u32 %v1458_v55, 16  ;;  %v1001_v16 = vrot.slane %v999_v3, 1  ;;  %v990_v18 = vshrl.u32 %v1457_v58, 16  ;;  %v1843_v23 = vld [vmem:[%s1693_s20 + $0x28] sm:$0xf] }
  0x2d   : > { %1543 = vmatprep.subr.msk.bf16.mxu1 %vm690_vm0, %v1620_v48  ;;  %v228_v25 = vld [vmem:[%s1693_s20 + $0x2c] sm:$0x1]  ;;  %v227_v27 = vld [vmem:[%s1693_s20 + $0x24] sm:$0x1]  ;;  %v1604_v28 = vld [vmem:[%s1693_s20 + $0x70] ss:$0 sps:$4 sm:$0xff]  }
  0x2e   : > { %v994_v19 = vrot.slane %v992_v12, 1  ;;  %v1360_v29 = vcombine.low %v1843_v23, %v228_v25  ;;  %v1606_v32 = vld [vmem:[%s1693_s20 + $0x78] ss:$0 sps:$4 sm:$0xff]   ;;  %v1861_v39 = vld [vmem:[%s1693_s20 + $0x30] sm:$0xf] }
  0x2f   : > { %599 = vrot.lane.b32.xlu1 %v564_v2, %s1648_s22  ;;  %597 = vrot.lane.b32.xlu0 %v557_v4, %s1648_s22  ;;  %v987_v2 = vrot.slane %v985_v54, 1  ;;  %v1599_v4 = vld [vmem:[%s1693_s20 + $0x60] ss:$0 sps:$4 sm:$0xff]   ;;  %v1444_v41 = vld [vmem:[%s1693_s20 + $0x34] sm:$0x1] }
  0x30   : > { %v995_v22 = vor.u32 %v994_v19, %v990_v18  ;;  %v349_v35 = vshll.u32 %v1360_v29, 16  ;;  %v1443_v43 = vld [vmem:[%s1693_s20 + $0x2c] sm:$0x1]  ;;  %v1609_v45 = vld [vmem:[%s1693_s20 + $0x78] ss:$0 sps:$4 sm:$0xff]   ;;  %v347_v47 = vshrl.u32 %v1360_v29, 16  ;;  %v1460_v50 = vcombine.low %v1861_v39, %v1444_v41 }
  0x31   : > { %v1875_v55 = vld [vmem:[%s1693_s20 + $0x38] sm:$0xf]  ;;  %v1879_v57 = vld [vmem:[%s1693_s20 + $0x30] sm:$0xf]  ;;  %v229_v58 = vld [vmem:[%s1693_s20 + $0x34] sm:$0x1] }
  0x32   : > { %v351_v48 = vrot.slane %v349_v35, 1  ;;  %v1013_v61 = vshll.u32 %v1460_v50, 16  ;;  %v1361_v3 = vcombine.low %v1879_v57, %v229_v58  ;;  %v1445_v12 = vld [vmem:[%s1693_s20 + $0x3c] sm:$0x1]  ;;  %v1613_v19 = vld [vmem:[%s1693_s20 + $0x80] ss:$0 sps:$4 sm:$0xff]  }
  0x33   : > { %491 = vrot.lane.b32.xlu1 %v1588_v13, %s1647_s21  ;;  %489 = vrot.lane.b32.xlu0 %v1589_v17, %s1647_s21  ;;  %v988_v13 = vor.u32 %v987_v2, %v983_v1  ;;  %v981_v17 = vor.u32 %v980_v8, %v976_v5  ;;  %v1446_v5 = vld [vmem:[%s1693_s20 + $0x44] sm:$0x1]  ;;  %v1891_v8 = vld [vmem:[%s1693_s20 + $0x38] sm:$0xf] }
  0x34   : > { %v352_v60 = vor.u32 %v351_v48, %v347_v47  ;;  %v356_v25 = vshll.u32 %v1361_v3, 16 }
  0x36   : > { %v358_v35 = vrot.slane %v356_v25, 1 }
  0x37   : > { %495 = vrot.lane.b32.xlu1 %v1590_v21, %s1647_s21  ;;  %493 = vrot.lane.b32.xlu0 %v1591_v26, %s1647_s21  ;;  %v1002_v21 = vor.u32 %v1001_v16, %v997_v15  ;;  %v1847_v26 = vld [vmem:[%s1693_s20 + $0x20] sm:$0xf]  ;;  %v1011_v15 = vshrl.u32 %v1460_v50, 16  ;;  %v1015_v16 = vrot.slane %v1013_v61, 1 }
  0x38   : > { %v1359_v31 = vcombine.low %v1847_v26, %v227_v27  ;;  %v1461_v27 = vcombine.low %v1891_v8, %v1445_v12 }
  0x3a   : > { %v342_v37 = vshll.u32 %v1359_v31, 16  ;;  %v340_v51 = vshrl.u32 %v1359_v31, 16  ;;  %v1018_v47 = vshrl.u32 %v1461_v27, 16 }
  0x3b   : > { %603 = vrot.lane.b32.xlu1 %v578_v30, %s1648_s22  ;;  %601 = vrot.lane.b32.xlu0 %v571_v34, %s1648_s22  ;;  %v1605_v30 = vld [vmem:[%s1693_s20 + $0x68] ss:$0 sps:$4 sm:$0xff]   ;;  %v1607_v34 = vld [vmem:[%s1693_s20 + $0x70] ss:$0 sps:$4 sm:$0xff]  }
  0x3f   : > { %607 = vrot.lane.b32.xlu1 %v592_v42, %s1648_s22  ;;  %605 = vrot.lane.b32.xlu0 %v585_v44, %s1648_s22  ;;  %v1865_v42 = vld [vmem:[%s1693_s20 + $0x28] sm:$0xf]  ;;  %v1608_v44 = vld [vmem:[%s1693_s20 + $0x80] ss:$0 sps:$4 sm:$0xff]  }
  0x40   : > { %v1459_v54 = vcombine.low %v1865_v42, %v1443_v43 }
  0x42   : > { %v1006_v2 = vshll.u32 %v1459_v54, 16 }
  0x43   : > { %921 = vrot.lane.b32.xlu1 %v1596_v53, %s1647_s21  ;;  %919 = vrot.lane.b32.xlu0 %v1597_v56, %s1647_s21  ;;  %v344_v53 = vrot.slane %v342_v37, 1  ;;  %v230_v56 = vld [vmem:[%s1693_s20 + $0x3c] sm:$0x1]  ;;  %v1020_v37 = vshll.u32 %v1461_v27, 16 }
  0x45   : > { %v345_v1 = vor.u32 %v344_v53, %v340_v51  ;;  %v1022_v48 = vrot.slane %v1020_v37, 1 }
  0x47   : > { %925 = vrot.lane.b32.xlu1 %v1598_v63, %s1647_s21  ;;  %923 = vrot.lane.b32.xlu0 %v1599_v4, %s1647_s21  ;;  %v1362_v63 = vcombine.low %v1875_v55, %v230_v56  ;;  %v1887_v4 = vld [vmem:[%s1693_s20 + $0x40] sm:$0xf]  ;;  %v1023_v51 = vor.u32 %v1022_v48, %v1018_v47 }
  0x48   : > { %v1462_v18 = vcombine.low %v1887_v4, %v1446_v5 }
  0x49   : > { %v361_v29 = vshrl.u32 %v1362_v63, 16 }
  0x4a   : > { %v1027_v31 = vshll.u32 %v1462_v18, 16  ;;  %v1025_v43 = vshrl.u32 %v1462_v18, 16 }
  0x4b   : > { %1033 = vrot.lane.b32.xlu1 %v988_v13, %s1648_s22  ;;  %1031 = vrot.lane.b32.xlu0 %v981_v17, %s1648_s22  ;;  %v1612_v13 = vld [vmem:[%s1693_s20 + $0x88] ss:$0 sps:$4 sm:$0xff]   ;;  %v363_v17 = vshll.u32 %v1362_v63, 16 }
  0x4f   : > { %1037 = vrot.lane.b32.xlu1 %v1002_v21, %s1648_s22  ;;  %1035 = vrot.lane.b32.xlu0 %v995_v22, %s1648_s22  ;;  %v1004_v21 = vshrl.u32 %v1459_v54, 16  ;;  %v1008_v22 = vrot.slane %v1006_v2, 1 }
  0x53   : > { %265 = vrot.lane.b32.xlu1 %v1604_v28, %s1647_s21  ;;  %263 = vrot.lane.b32.xlu0 %v1605_v30, %s1647_s21  ;;  %v1016_v28 = vor.u32 %v1015_v16, %v1011_v15  ;;  %v365_v30 = vrot.slane %v363_v17, 1 }
  0x55   : > { %v366_v41 = vor.u32 %v365_v30, %v361_v29 }
  0x57   : > { %929 = vrot.lane.b32.xlu1 %v1606_v32, %s1647_s21  ;;  %927 = vrot.lane.b32.xlu0 %v1607_v34, %s1647_s21  ;;  %v1009_v32 = vor.u32 %v1008_v22, %v1004_v21  ;;  %v354_v34 = vshrl.u32 %v1361_v3, 16 }
  0x5b   : > { %269 = vrot.lane.b32.xlu1 %v1608_v44, %s1647_s21  ;;  %267 = vrot.lane.b32.xlu0 %v1609_v45, %s1647_s21  ;;  %v1029_v44 = vrot.slane %v1027_v31, 1  ;;  %v359_v45 = vor.u32 %v358_v35, %v354_v34 }
  0x5d   : > { %v1030_v50 = vor.u32 %v1029_v44, %v1025_v43 }
  0x5f   : > { %377 = vrot.lane.b32.xlu1 %v352_v60, %s1648_s22  ;;  %375 = vrot.lane.b32.xlu0 %v345_v1, %s1648_s22 }
  0x63   : > { %933 = vrot.lane.b32.xlu1 %v1612_v13, %s1647_s21  ;;  %931 = vrot.lane.b32.xlu0 %v1613_v19, %s1647_s21 }
  0x67   : > { %1041 = vrot.lane.b32.xlu1 %v1016_v28, %s1648_s22  ;;  %1039 = vrot.lane.b32.xlu0 %v1009_v32, %s1648_s22 }
  0x6b   : > { %381 = vrot.lane.b32.xlu1 %v366_v41, %s1648_s22  ;;  %379 = vrot.lane.b32.xlu0 %v359_v45, %s1648_s22 }
  0x6f   : > { %1045 = vrot.lane.b32.xlu1 %v1030_v50, %s1648_s22  ;;  %1043 = vrot.lane.b32.xlu0 %v1023_v51, %s1648_s22 }
  0x85   : > { %v482_v53 = vpop.permute.xlu1 %481  ;;  %v256_v54 = vpop.permute.xlu0 %255 }
  0x86   : > { %v386_v5 = vsel %vm383_vm1, %v1710_v9, %v256_v54  ;;  %v611_v19 = vsel %vm383_vm1, %v1720_v14, %v482_v53 }
  0x89   : > { %v484_v56 = vpop.permute.xlu1 %483  ;;  %v258_v58 = vpop.permute.xlu0 %257 }
  0x8a   : > { %v389_v2 = vsel %vm383_vm1, %v1704_v6, %v258_v58  ;;  %v614_v17 = vsel %vm383_vm1, %v1714_v11, %v484_v56 }
  0x8d   : > { %v262_v60 = vpop.permute.xlu1 %261  ;;  %v260_v61 = vpop.permute.xlu0 %259 }
  0x8e   : > { %v395_v25 = vsel %vm383_vm1, %v1727_v20, %v262_v60  ;;  %v392_v28 = vsel %vm383_vm1, %v1731_v24, %v260_v61 }
  0x91   : > { %v488_v63 = vpop.permute.xlu1 %487  ;;  %v486_v1 = vpop.permute.xlu0 %485 }
  0x92   : > { %v620_v31 = vsel %vm383_vm1, %v1739_v33, %v488_v63  ;;  %v617_v34 = vsel %vm383_vm1, %v1744_v36, %v486_v1 }
  0x95   : > { %v370_v3 = vpop.permute.xlu1 %369  ;;  %v368_v13 = vpop.permute.xlu0 %367 }
  0x96   : > { %v412_v12 = vsel %vm408_vm2, %v389_v2, %v370_v3  ;;  %v410_v15 = vsel %vm408_vm2, %v386_v5, %v368_v13 }
  0x97   : > { %v1414_v16 = vcombine.low %v410_v15, %v412_v12 }
  0x99   : > { %v596_v18 = vpop.permute.xlu1 %595  ;;  %1505 = vmatprep.mubr.msk.bf16.mxu0 %vm677_vm3, %v1414_v16  ;;  %v594_v21 = vpop.permute.xlu0 %593 }
  0x9a   : > { %v636_v6 = vsel %vm408_vm2, %v614_v17, %v596_v18  ;;  %v634_v9 = vsel %vm408_vm2, %v611_v19, %v594_v21 }
  0x9b   : > { %v1405_v22 = vcombine.low %v634_v9, %v636_v6 }
  0x9d   : > { %v374_v27 = vpop.permute.xlu1 %373  ;;  %1495 = vmatprep.mubr.msk.bf16.mxu1 %vm677_vm3, %v1405_v22  ;;  %v372_v14 = vpop.permute.xlu0 %371 }
  0x9e   : > { %v416_v11 = vsel %vm408_vm2, %v395_v25, %v374_v27  ;;  %v414_v29 = vsel %vm408_vm2, %v392_v28, %v372_v14 }
  0x9f   : > { %v1415_v30 = vcombine.low %v414_v29, %v416_v11 }
  0xa1   : > { %v600_v32 = vpop.permute.xlu1 %599  ;;  %1506 = vmatmul.mubr.msk.bf16.vlgmr.msra.gmra.mrb[0].mxu0 %vm677_vm3, %v1415_v30  ;;  %v598_v24 = vpop.permute.xlu0 %597 }
  0xa2   : > { %v640_v20 = vsel %vm408_vm2, %v620_v31, %v600_v32  ;;  %v638_v35 = vsel %vm408_vm2, %v617_v34, %v598_v24  ;;  %1514 = vmatpush3.bf16.msra.mxu0 %v1831_v62 }
  0xa3   : > { %v1406_v37 = vcombine.low %v638_v35, %v640_v20 }
  0xa5   : > { %v492_v41 = vpop.permute.xlu1 %491  ;;  %1496 = vmatmul.mubr.msk.bf16.vlgmr.msra.gmra.mrb[0].mxu1 %vm677_vm3, %v1406_v37  ;;  %v490_v43 = vpop.permute.xlu0 %489 }
  0xa6   : > { %1524 = vmatpush3.bf16.msra.mxu1 %v1815_v52  ;;  %v626_v36 = vsel %vm383_vm1, %v1755_v59, %v492_v41  ;;  %v623_v47 = vsel %vm383_vm1, %v1760_v0, %v490_v43 }
  0xa9   : > { %v496_v33 = vpop.permute.xlu1 %495  ;;  %v494_v44 = vpop.permute.xlu0 %493 }
  0xaa   : > { %v632_v53 = vsel %vm383_vm1, %v1768_v7, %v496_v33  ;;  %v629_v52 = vsel %vm383_vm1, %v1772_v10, %v494_v44 }
  0xad   : > { %v604_v45 = vpop.permute.xlu1 %603  ;;  %v602_v50 = vpop.permute.xlu0 %601 }
  0xae   : > { %v644_v48 = vsel %vm408_vm2, %v626_v36, %v604_v45  ;;  %v642_v62 = vsel %vm408_vm2, %v623_v47, %v602_v50 }
  0xaf   : > { %v1407_v51 = vcombine.low %v642_v62, %v644_v48 }
  0xb1   : > { %v608_v54 = vpop.permute.xlu1 %607  ;;  %1499 = vmatprep.mubr.msk.bf16.mxu1 %vm677_vm3, %v1407_v51  ;;  %v606_v59 = vpop.permute.xlu0 %605 }
  0xb2   : > { %v648_v56 = vsel %vm408_vm2, %v632_v53, %v608_v54  ;;  %v646_v0 = vsel %vm408_vm2, %v629_v52, %v606_v59 }
  0xb3   : > { %v1408_v58 = vcombine.low %v646_v0, %v648_v56 }
  0xb5   : > { %v922_v60 = vpop.permute.xlu1 %921  ;;  %1500 = vmatmul.mubr.msk.bf16.gmra.mrb[4].mxu1 %vm677_vm3, %v1408_v58  ;;  %v920_v61 = vpop.permute.xlu0 %919 }
  0xb6   : > { %v1052_v7 = vsel %vm383_vm1, %v1788_v38, %v922_v60  ;;  %v1049_v10 = vsel %vm383_vm1, %v1792_v40, %v920_v61 }
  0xb9   : > { %v926_v63 = vpop.permute.xlu1 %925  ;;  %v924_v1 = vpop.permute.xlu0 %923 }
  0xba   : > { %v1058_v15 = vsel %vm383_vm1, %v1800_v46, %v926_v63  ;;  %v1055_v17 = vsel %vm383_vm1, %v1807_v49, %v924_v1 }
  0xbd   : > { %v1034_v2 = vpop.permute.xlu1 %1033  ;;  %v1032_v5 = vpop.permute.xlu0 %1031 }
  0xbe   : > { %v1074_v3 = vsel %vm408_vm2, %v1052_v7, %v1034_v2  ;;  %v1072_v12 = vsel %vm408_vm2, %v1049_v10, %v1032_v5 }
  0xbf   : > { %v1465_v13 = vcombine.low %v1072_v12, %v1074_v3 }
  0xc1   : > { %v1038_v16 = vpop.permute.xlu1 %1037  ;;  %1515 = vmatprep.mubr.msk.bf16.mxu0 %vm677_vm3, %v1465_v13  ;;  %v1036_v38 = vpop.permute.xlu0 %1035 }
  0xc2   : > { %v1078_v18 = vsel %vm408_vm2, %v1058_v15, %v1038_v16  ;;  %v1076_v40 = vsel %vm408_vm2, %v1055_v17, %v1036_v38 }
  0xc3   : > { %v1466_v19 = vcombine.low %v1076_v40, %v1078_v18 }
  0xc5   : > { %v266_v6 = vpop.permute.xlu1 %265  ;;  %1516 = vmatmul.mubr.msk.bf16.vlgmr.msra.gmra.mrb[0].mxu0 %vm677_vm3, %v1466_v19  ;;  %v264_v21 = vpop.permute.xlu0 %263 }
  0xc6   : > { %v401_v27 = vsel %vm383_vm1, %v1843_v23, %v266_v6  ;;  %v398_v28 = vsel %vm383_vm1, %v1847_v26, %v264_v21 }
  0xc9   : > { %v930_v9 = vpop.permute.xlu1 %929  ;;  %v928_v22 = vpop.permute.xlu0 %927 }
  0xca   : > { %v1064_v34 = vsel %vm383_vm1, %v1861_v39, %v930_v9  ;;  %v1061_v23 = vsel %vm383_vm1, %v1865_v42, %v928_v22 }
  0xcd   : > { %v270_v25 = vpop.permute.xlu1 %269  ;;  %v268_v46 = vpop.permute.xlu0 %267 }
  0xce   : > { %v407_v41 = vsel %vm383_vm1, %v1875_v55, %v270_v25  ;;  %v404_v33 = vsel %vm383_vm1, %v1879_v57, %v268_v46 }
  0xd1   : > { %v378_v49 = vpop.permute.xlu1 %377  ;;  %v376_v14 = vpop.permute.xlu0 %375 }
  0xd2   : > { %v420_v11 = vsel %vm408_vm2, %v401_v27, %v378_v49  ;;  %v418_v29 = vsel %vm408_vm2, %v398_v28, %v376_v14 }
  0xd3   : > { %v1416_v30 = vcombine.low %v418_v29, %v420_v11 }
  0xd5   : > { %v934_v31 = vpop.permute.xlu1 %933  ;;  %1509 = vmatprep.mubr.msk.bf16.mxu1 %vm677_vm3, %v1416_v30  ;;  %v932_v32 = vpop.permute.xlu0 %931 }
  0xd6   : > { %v1070_v45 = vsel %vm383_vm1, %v1887_v4, %v934_v31  ;;  %v1067_v55 = vsel %vm383_vm1, %v1891_v8, %v932_v32  ;;  %v1474_v8 = vld [vmem:[%s2031_s2] ss:$0 sm:$0xff] }
  0xd9   : > { %v1042_v20 = vpop.permute.xlu1 %1041  ;;  %v1040_v26 = vpop.permute.xlu0 %1039 }
  0xda   : > { %v1082_v24 = vsel %vm408_vm2, %v1064_v34, %v1042_v20  ;;  %v1080_v35 = vsel %vm408_vm2, %v1061_v23, %v1040_v26 }
  0xdb   : > { %v1467_v37 = vcombine.low %v1080_v35, %v1082_v24 }
  0xdd   : > { %v382_v43 = vpop.permute.xlu1 %381  ;;  %1519 = vmatprep.mubr.msk.bf16.mxu0 %vm677_vm3, %v1467_v37  ;;  %v380_v39 = vpop.permute.xlu0 %379 }
  0xde   : > { %v424_v44 = vsel %vm408_vm2, %v407_v41, %v382_v43  ;;  %v422_v42 = vsel %vm408_vm2, %v404_v33, %v380_v39 }
  0xdf   : > { %v1417_v36 = vcombine.low %v422_v42, %v424_v44 }
  0xe1   : > { %v1046_v47 = vpop.permute.xlu1 %1045  ;;  %1510 = vmatmul.mubr.msk.bf16.vlgmr.msra.gmra.mrb[4].mxu1 %vm677_vm3, %v1417_v36  ;;  %v1044_v57 = vpop.permute.xlu0 %1043 }
  0xe2   : > { %v1086_v48 = vsel %vm408_vm2, %v1070_v45, %v1046_v47  ;;  %v1084_v50 = vsel %vm408_vm2, %v1067_v55, %v1044_v57 }
  0xe3   : > { %v1468_v62 = vcombine.low %v1084_v50, %v1086_v48 }
  0xe5   : > { %1520 = vmatmul.mubr.msk.bf16.gmra.mrb[4].mxu0 %vm677_vm3, %v1468_v62 }
 0x178   : > { %v1497_v51 = vpop.f32.mrb[0].mxu1 }
 0x179   : > { %v728_v53 = vpop.f32.mrb[1].mxu1 }
 0x17a   : > { %v1498_v54 = vpop.f32.mrb[2].mxu1 }
 0x17b   : > { %v731_v52 = vpop.f32.mrb[3].mxu1 }
 0x198   : > { %v1517_v4 = vpop.f32.mrb[0].mxu0 }
 0x199   : > { %v1525_v56 = vadd.f32 %v1517_v4, %v1497_v51  ;;  %v1164_v59 = vpop.f32.mrb[1].mxu0 }
 0x19a   : > { %v1526_v0 = vadd.f32 %v1164_v59, %v728_v53  ;;  %v1518_v58 = vpop.f32.mrb[2].mxu0 }
 0x19b   : > { %v1212_v60 = vadd.f32 %v1525_v56, %v1474_v8  ;;  %v1527_v61 = vadd.f32 %v1518_v58, %v1498_v54  ;;  %v1167_v63 = vpop.f32.mrb[3].mxu0 }
 0x19c   : > { %v1210_v1 = vadd.f32 %v1526_v0, %v1474_v8  ;;  %v1528_v7 = vadd.f32 %v1167_v63, %v731_v52 }
 0x19d   : > { %1220 = vst.msk [vmem:[%s2002_s7 + $0x10] sm:$0xff] %vm408_vm2, %v1212_v60  ;;  %v1213_v2 = vadd.f32 %v1527_v61, %v1474_v8 }
 0x19e   : > { %1218 = vst.msk [vmem:[%s2002_s7] sm:$0xff] %vm408_vm2, %v1210_v1  ;;  %v1211_v10 = vadd.f32 %v1528_v7, %v1474_v8 }
 0x19f   : > { %1221 = vst.msk [vmem:[%s2002_s7 + $0x18] sm:$0xff] %vm408_vm2, %v1213_v2 }
 0x1a0   : > { %1219 = vst.msk [vmem:[%s2002_s7 + $0x8] sm:$0xff] %vm408_vm2, %v1211_v10 }
 0x1b4   : > { %v1511_v3 = vpop.f32.mrb[4].mxu1 }
 0x1b5   : > { %v849_v5 = vpop.f32.mrb[5].mxu1 }
 0x1b6   : > { %v1512_v12 = vpop.f32.mrb[6].mxu1 }
 0x1b7   : > { %v852_v13 = vpop.f32.mrb[7].mxu1 }
 0x1b8   : > { %v1521_v15 = vpop.f32.mrb[4].mxu0 }
 0x1b9   : > { %v1529_v16 = vadd.f32 %v1521_v15, %v1511_v3  ;;  %v1180_v17 = vpop.f32.mrb[5].mxu0 }
 0x1ba   : > { %v1530_v18 = vadd.f32 %v1180_v17, %v849_v5  ;;  %v1522_v38 = vpop.f32.mrb[6].mxu0 }
 0x1bb   : > { %v1216_v40 = vadd.f32 %v1529_v16, %v1474_v8  ;;  %v1531_v19 = vadd.f32 %v1522_v38, %v1512_v12  ;;  %v1183_v6 = vpop.f32.mrb[7].mxu0 }
 0x1bc   : > { %v1214_v21 = vadd.f32 %v1530_v18, %v1474_v8  ;;  %v1532_v9 = vadd.f32 %v1183_v6, %v852_v13 }
 0x1bd   : > { %1224 = vst.msk [vmem:[%s2002_s7 + $0x30] sm:$0xff] %vm408_vm2, %v1216_v40  ;;  %v1217_v22 = vadd.f32 %v1531_v19, %v1474_v8 }
 0x1be   : > { %1222 = vst.msk [vmem:[%s2002_s7 + $0x20] sm:$0xff] %vm408_vm2, %v1214_v21  ;;  %v1215_v25 = vadd.f32 %v1532_v9, %v1474_v8 }
 0x1bf   : > { %1225 = vst.msk [vmem:[%s2002_s7 + $0x38] sm:$0xff] %vm408_vm2, %v1217_v22 }
 0x1c0   : > { %1223 = vst.msk [vmem:[%s2002_s7 + $0x28] sm:$0xff] %vm408_vm2, %v1215_v25 }
 0x1c1 PF: > { %s13_s14 = sadd.s32 1, %s1645_s14   ;;  %s2033_s12 = smov %s1641_s13 }
 0x1c2   : > { %p10_p6 = scmp.ge.s32.totalorder %s13_s14, 4   ;;  %s2034_s13 = smov %s2036_s15 }
 0x1c4   :  { %12 = sbr.rel (!%p10_p6) target bundleno = 2 (0x2), region = 70 }

</bundles_post_ra>
